<compile_context>
chip_gen: v7x
topology: tpu7x:2x2x1
jax: 0.10.0
libtpu: 0.0.40
codegen_flags: <defaults>
</compile_context>

<pallas_src>
import functools

import numpy as np
import jax
import jax.numpy as jnp
from jax.experimental import pallas as pl
from jax.experimental.pallas import tpu as pltpu

BN_EPS = 1e-5


# ----------------------------------------------------------------------------------------------
# Host-side static matrix builders (numpy, run once).
# ----------------------------------------------------------------------------------------------

def _bilinear_up_matrix(l_in, scale=2):
    """1-D interpolation matrix of nn.Upsample(scale_factor=2, bilinear, align_corners=True)."""
    l_out = l_in * scale
    u = np.zeros((l_out, l_in), np.float32)
    if l_in == 1:
        u[:, 0] = 1.0
        return u
    for i in range(l_out):
        src = i * (l_in - 1) / (l_out - 1)
        lo = min(int(np.floor(src)), l_in - 2)
        frac = src - lo
        u[i, lo] += 1.0 - frac
        u[i, lo + 1] += frac
    return u


def _pad_rows(u, out_len, offset):
    p = np.zeros((out_len, u.shape[1]), np.float32)
    p[offset:offset + u.shape[0], :] = u
    return p


def _upsample_pad_matrices(h1, w1, h2, w2):
    uh, uw = _bilinear_up_matrix(h1), _bilinear_up_matrix(w1)
    dy, dx = h2 - uh.shape[0], w2 - uw.shape[0]
    assert dy >= 0 and dx >= 0, "x2 spatial must be >= 2*x1 spatial (negative F.pad unsupported)"
    return _pad_rows(uh, h2, dy // 2), _pad_rows(uw, w2, dx // 2)


def _build_structural(c1, c2, h1, w1, h2, w2):
    """R1 (W-upsample+pad + x1 channel placement at offset c2), uh_p (per-batch H-upsample+pad),
    P2 (x2 channel placement) for the lane-dense (N*H, W*C) layout, cat order [x2, x1]."""
    c_in = c1 + c2
    uh_p, uw_p = _upsample_pad_matrices(h1, w1, h2, w2)
    r1 = np.zeros((w1 * c1, w2 * c_in), np.float32)
    for wi in range(w1):
        for c in range(c1):
            for wo in range(w2):
                r1[wi * c1 + c, wo * c_in + c2 + c] = uw_p[wo, wi]
    p2 = np.zeros((w2 * c2, w2 * c_in), np.float32)
    for w in range(w2):
        for c in range(c2):
            p2[w * c2 + c, w * c_in + c] = 1.0
    return r1, uh_p, p2


def _toeplitz_conv_kh_blocks(w_oihw, width):
    """3x3 conv (stride 1, W-padding=1 folded in) as 3 per-kh (W*Cin, W*Cout) matrices.
    Row index = wp*Cin + ci, column index = w*Cout + co."""
    co_, ci_, kh_, kw_ = w_oihw.shape
    assert kh_ == 3 and kw_ == 3
    blocks = np.zeros((3, width * ci_, width * co_), np.float32)
    for kh in range(3):
        for w in range(width):
            for kw in range(3):
                wp = w + kw - 1
                if 0 <= wp < width:
                    r0 = wp * ci_
                    c0 = w * co_
                    blocks[kh, r0:r0 + ci_, c0:c0 + co_] = w_oihw[:, :, kh, kw].T
    return blocks


# ----------------------------------------------------------------------------------------------
# The fused Pallas kernel.
# ----------------------------------------------------------------------------------------------

def _up_double_conv_kernel(N, H1, H2, W2, c_in, c_out,
                           x1_ref, x2_ref, r1_ref, l_ref, p2_ref,
                           w1_ref, g1_ref, be1_ref,
                           w2_ref, g2_ref, be2_ref,
                           s_ref, st_ref,
                           o_ref, pad_ref):
    f32 = jnp.float32
    bf16 = jnp.bfloat16
    inv_count = 1.0 / float(N * H2 * W2)
    wc_in, wc_out = W2 * c_in, W2 * c_out
    wc_pad = pad_ref.shape[-1]

    # ---- Upsample(bilinear, align_corners=True) + F.pad + cat([x2, x1], channels) ----
    # W upsample/pad + channel placement (bf16 operands, f32 accumulate on MXU).
    t = jnp.dot(x1_ref[...], r1_ref[...], preferred_element_type=f32)        # (N*H1, W2*Cin)
    t_b = t.reshape(N, H1, wc_in).astype(bf16)
    # H upsample/pad: per-batch (H2,H1)@(H1,W2*Cin) matmuls (no block-diag zero MACs).
    up = jnp.concatenate(
        [jnp.dot(l_ref[...], t_b[b], preferred_element_type=f32) for b in range(N)],
        axis=0)                                                              # (N*H2, W2*Cin)
    cat = up + jnp.dot(x2_ref[...], p2_ref[...], preferred_element_type=f32)  # (N*H2, W2*Cin)

    def conv_bn_relu(inp_rows, c, w_ref, g_ref, be_ref):
        wc = W2 * c
        pref = pad_ref if wc == wc_pad else pad_ref.at[:, :, 0:wc]
        # H halo only (W pad is folded into the Toeplitz weights); interior fully overwritten.
        zrow = jnp.zeros((N, 1, wc), bf16)
        pref[:, 0:1, :] = zrow
        pref[:, H2 + 1:H2 + 2, :] = zrow
        pref[:, 1:H2 + 1, :] = inp_rows.reshape(N, H2, wc).astype(bf16)
        # 3 accumulating bf16 kh-matmuls on row-shifted views (no im2col slab materialized).
        y = jnp.zeros((N * H2, wc_out), f32)
        for kh in range(3):
            sl = pref[:, kh:kh + H2, :].reshape(N * H2, wc)
            y = y + jnp.dot(sl, w_ref[kh], preferred_element_type=f32)
        # Training-mode BatchNorm (batch stats), one pass, folded to per-channel scale/shift.
        # Conv bias is omitted: it is exactly cancelled by the mean subtraction below.
        col_s = jnp.sum(y, axis=0, keepdims=True)                 # (1, W2*c_out)
        col_ss = jnp.sum(y * y, axis=0, keepdims=True)
        stats = jnp.dot(jnp.concatenate([col_s, col_ss], axis=0), s_ref[...],
                        preferred_element_type=f32) * inv_count   # (2, c_out)
        mean = stats[0:1, :]
        var = jnp.maximum(stats[1:2, :] - mean * mean, 0.0)
        scale = g_ref[...] * jax.lax.rsqrt(var + BN_EPS)
        shift = be_ref[...] - mean * scale
        rows = jnp.dot(jnp.concatenate([scale, shift], axis=0), st_ref[...],
                       preferred_element_type=f32)                # (2, W2*c_out)
        return jnp.maximum(y * rows[0:1, :] + rows[1:2, :], 0.0)  # ReLU

    a1 = conv_bn_relu(cat, c_in, w1_ref, g1_ref, be1_ref)
    a2 = conv_bn_relu(a1, c_out, w2_ref, g2_ref, be2_ref)
    o_ref[...] = a2.astype(o_ref.dtype)                           # lane-dense (N*H2, W2*Cout)


# ----------------------------------------------------------------------------------------------
# Parameters + wrapper.
# ----------------------------------------------------------------------------------------------

def init_params(key, in_ch, out_ch):
    """PyTorch-like init: Conv2d weight/bias ~ U(-1/sqrt(fan_in), +), BN gamma=1, beta=0."""
    k1, k2, k3, k4 = jax.random.split(key, 4)
    bd1 = 1.0 / float(np.sqrt(in_ch * 9))
    bd2 = 1.0 / float(np.sqrt(out_ch * 9))
    return dict(
        w1=jax.random.uniform(k1, (out_ch, in_ch, 3, 3), jnp.float32, -bd1, bd1),
        b1=jax.random.uniform(k2, (out_ch,), jnp.float32, -bd1, bd1),
        g1=jnp.ones((out_ch,), jnp.float32), be1=jnp.zeros((out_ch,), jnp.float32),
        w2=jax.random.uniform(k3, (out_ch, out_ch, 3, 3), jnp.float32, -bd2, bd2),
        b2=jax.random.uniform(k4, (out_ch,), jnp.float32, -bd2, bd2),
        g2=jnp.ones((out_ch,), jnp.float32), be2=jnp.zeros((out_ch,), jnp.float32),
    )


def make_up_forward(params, N, C1, H1, W1, C2, H2, W2, out_ch):
    """Builds the pallas_call once and returns a jitted NCHW->NCHW forward."""
    c_in = C1 + C2
    r1, uh_p, p2 = _build_structural(C1, C2, H1, W1, H2, W2)
    s_np = np.tile(np.eye(out_ch, dtype=np.float32), (W2, 1))       # (W2*out, out)
    st_np = np.ascontiguousarray(s_np.T)                            # (out, W2*out)

    # Conv weights as bf16 per-kh Toeplitz blocks; BN params as f32 rows.
    w1blk = jnp.asarray(_toeplitz_conv_kh_blocks(np.asarray(params['w1'], np.float32), W2),
                        jnp.bfloat16)
    w2blk = jnp.asarray(_toeplitz_conv_kh_blocks(np.asarray(params['w2'], np.float32), W2),
                        jnp.bfloat16)
    g1 = jnp.asarray(params['g1'], jnp.float32)[None, :]
    be1 = jnp.asarray(params['be1'], jnp.float32)[None, :]
    g2 = jnp.asarray(params['g2'], jnp.float32)[None, :]
    be2 = jnp.asarray(params['be2'], jnp.float32)[None, :]
    # Structural matrices in bf16 (R1/P2 are 0/1 placements: exact in bf16).
    r1_j = jnp.asarray(r1, jnp.bfloat16)
    l_j = jnp.asarray(uh_p, jnp.bfloat16)
    p2_j = jnp.asarray(p2, jnp.bfloat16)
    s_j, st_j = jnp.asarray(s_np), jnp.asarray(st_np)

    wc_pad = W2 * max(c_in, out_ch)
    vmem = pl.BlockSpec(memory_space=pltpu.MemorySpace.VMEM)
    kernel = functools.partial(_up_double_conv_kernel, N, H1, H2, W2, c_in, out_ch)
    call = pl.pallas_call(
        kernel,
        out_shape=jax.ShapeDtypeStruct((N * H2, W2 * out_ch), jnp.float32),
        in_specs=[vmem] * 13,
        out_specs=vmem,
        # One shared bf16 pad scratch for both convs (interior fully overwritten per conv).
        scratch_shapes=[pltpu.VMEM((N, H2 + 2, wc_pad), jnp.bfloat16)],
        # Explicit VMEM budget (well under the per-core scoped defaults at these sizes).
        compiler_params=pltpu.CompilerParams(vmem_limit_bytes=32 * 1024 * 1024),
    )

    @jax.jit
    def forward(x1_nchw, x2_nchw):
        x1 = jnp.transpose(x1_nchw, (0, 2, 3, 1)).reshape(N * H1, W1 * C1).astype(jnp.bfloat16)
        x2 = jnp.transpose(x2_nchw, (0, 2, 3, 1)).reshape(N * H2, W2 * C2).astype(jnp.bfloat16)
        y = call(x1, x2, r1_j, l_j, p2_j,
                 w1blk, g1, be1, w2blk, g2, be2, s_j, st_j)
        return jnp.transpose(y.reshape(N, H2, W2, out_ch), (0, 3, 1, 2))

    return forward


# ----------------------------------------------------------------------------------------------
# Pure-JAX reference (XLA) for a numerical check. Keeps the conv bias (the kernel drops it
# because BN's mean subtraction cancels it exactly).
# ----------------------------------------------------------------------------------------------

def reference_forward(x1_nchw, x2_nchw, params, H1, W1, H2, W2):
    uh_p, uw_p = _upsample_pad_matrices(H1, W1, H2, W2)
    x1 = x1_nchw.astype(jnp.float32)
    up = jnp.einsum('Oh,nchw->ncOw', jnp.asarray(uh_p), x1)
    up = jnp.einsum('Pw,ncOw->ncOP', jnp.asarray(uw_p), up)
    x = jnp.concatenate([x2_nchw.astype(jnp.float32), up], axis=1)

    def conv_bn_relu(x, w, b, g, be):
        y = jax.lax.conv_general_dilated(
            x, w, window_strides=(1, 1), padding=((1, 1), (1, 1)),
            dimension_numbers=('NCHW', 'OIHW', 'NCHW')) + b[None, :, None, None]
        mean = jnp.mean(y, axis=(0, 2, 3), keepdims=True)
        var = jnp.mean((y - mean) ** 2, axis=(0, 2, 3), keepdims=True)
        y = g[None, :, None, None] * (y - mean) * jax.lax.rsqrt(var + BN_EPS) \
            + be[None, :, None, None]
        return jnp.maximum(y, 0.0)

    x = conv_bn_relu(x, params['w1'], params['b1'], params['g1'], params['be1'])
    x = conv_bn_relu(x, params['w2'], params['b2'], params['g2'], params['be2'])
    return x


if __name__ == "__main__":
    key = jax.random.PRNGKey(0)
    kx1, kx2, kp = jax.random.split(key, 3)

    # Up(in_ch=8, out_ch=8): x1 is the low-res decoder feature, x2 the skip connection.
    N, C1, H1, W1 = 2, 4, 8, 8
    C2, H2, W2 = 4, 16, 16
    in_ch, out_ch = C1 + C2, 8

    x1 = jax.random.normal(kx1, (N, C1, H1, W1), jnp.float32)
    x2 = jax.random.normal(kx2, (N, C2, H2, W2), jnp.float32)
    params = init_params(kp, in_ch, out_ch)

    fwd = make_up_forward(params, N, C1, H1, W1, C2, H2, W2, out_ch)
    y = jax.block_until_ready(fwd(x1, x2))

    assert y.shape == (N, out_ch, H2, W2), y.shape
    assert bool(jnp.all(jnp.isfinite(y)))

    ref = jax.block_until_ready(reference_forward(x1, x2, params, H1, W1, H2, W2))
    np.testing.assert_allclose(np.asarray(y), np.asarray(ref), rtol=5e-2, atol=5e-2)

    print("KERNEL_OK")
</pallas_src>

<mosaic_0001>
module attributes {stable_mosaic.version = 11 : i64} {
  func.func @_up_double_conv_kernel(%arg0: memref<16x32xbf16, #tpu.memory_space<vmem>>, %arg1: memref<32x64xbf16, #tpu.memory_space<vmem>>, %arg2: memref<32x128xbf16, #tpu.memory_space<vmem>>, %arg3: memref<16x8xbf16, #tpu.memory_space<vmem>>, %arg4: memref<64x128xbf16, #tpu.memory_space<vmem>>, %arg5: memref<3x128x128xbf16, #tpu.memory_space<vmem>>, %arg6: memref<1x8xf32, #tpu.memory_space<vmem>>, %arg7: memref<1x8xf32, #tpu.memory_space<vmem>>, %arg8: memref<3x128x128xbf16, #tpu.memory_space<vmem>>, %arg9: memref<1x8xf32, #tpu.memory_space<vmem>>, %arg10: memref<1x8xf32, #tpu.memory_space<vmem>>, %arg11: memref<128x8xf32, #tpu.memory_space<vmem>>, %arg12: memref<8x128xf32, #tpu.memory_space<vmem>>, %arg13: memref<32x128xf32, #tpu.memory_space<vmem>>, %arg14: memref<2x18x128xbf16, #tpu.memory_space<vmem>>) attributes {dimension_semantics = [], scalar_prefetch = 0 : i64, scratch_operands = 1 : i64, tpu.core_type = #tpu.core_type<tc>} {
    %c0 = arith.constant 0 : index
    %c0_0 = arith.constant 0 : index
    %0 = vector.load %arg0[%c0, %c0_0] : memref<16x32xbf16, #tpu.memory_space<vmem>>, vector<16x32xbf16>
    %c0_1 = arith.constant 0 : index
    %c0_2 = arith.constant 0 : index
    %1 = vector.load %arg2[%c0_1, %c0_2] : memref<32x128xbf16, #tpu.memory_space<vmem>>, vector<32x128xbf16>
    %cst = arith.constant dense<0.000000e+00> : vector<16x128xf32>
    %2 = tpu.matmul %0, %1, %cst {dimension_numbers = #tpu.dot_dimension_numbers<[1], [0], [0], [1], [0, 0, 1, 1], [], []>} : vector<16x32xbf16>, vector<32x128xbf16>, vector<16x128xf32> -> vector<16x128xf32>
    %3 = vector.shape_cast %2 : vector<16x128xf32> to vector<2x8x128xf32>
    %4 = arith.truncf %3 : vector<2x8x128xf32> to vector<2x8x128xbf16>
    %c0_3 = arith.constant 0 : index
    %c0_4 = arith.constant 0 : index
    %5 = vector.load %arg3[%c0_3, %c0_4] : memref<16x8xbf16, #tpu.memory_space<vmem>>, vector<16x8xbf16>
    %6 = vector.extract_strided_slice %4 {offsets = [0, 0, 0], sizes = [1, 8, 128], strides = [1, 1, 1]} : vector<2x8x128xbf16> to vector<1x8x128xbf16>
    %7 = vector.shape_cast %6 : vector<1x8x128xbf16> to vector<8x128xbf16>
    %cst_5 = arith.constant dense<0.000000e+00> : vector<16x128xf32>
    %8 = tpu.matmul %5, %7, %cst_5 {dimension_numbers = #tpu.dot_dimension_numbers<[1], [0], [0], [1], [0, 0, 1, 1], [], []>} : vector<16x8xbf16>, vector<8x128xbf16>, vector<16x128xf32> -> vector<16x128xf32>
    %c0_6 = arith.constant 0 : index
    %c0_7 = arith.constant 0 : index
    %9 = vector.load %arg3[%c0_6, %c0_7] : memref<16x8xbf16, #tpu.memory_space<vmem>>, vector<16x8xbf16>
    %10 = vector.extract_strided_slice %4 {offsets = [1, 0, 0], sizes = [1, 8, 128], strides = [1, 1, 1]} : vector<2x8x128xbf16> to vector<1x8x128xbf16>
    %11 = vector.shape_cast %10 : vector<1x8x128xbf16> to vector<8x128xbf16>
    %cst_8 = arith.constant dense<0.000000e+00> : vector<16x128xf32>
    %12 = tpu.matmul %9, %11, %cst_8 {dimension_numbers = #tpu.dot_dimension_numbers<[1], [0], [0], [1], [0, 0, 1, 1], [], []>} : vector<16x8xbf16>, vector<8x128xbf16>, vector<16x128xf32> -> vector<16x128xf32>
    %13 = tpu.concatenate %8, %12 in 0 : vector<16x128xf32>, vector<16x128xf32> -> vector<32x128xf32>
    %c0_9 = arith.constant 0 : index
    %c0_10 = arith.constant 0 : index
    %14 = vector.load %arg1[%c0_9, %c0_10] : memref<32x64xbf16, #tpu.memory_space<vmem>>, vector<32x64xbf16>
    %c0_11 = arith.constant 0 : index
    %c0_12 = arith.constant 0 : index
    %15 = vector.load %arg4[%c0_11, %c0_12] : memref<64x128xbf16, #tpu.memory_space<vmem>>, vector<64x128xbf16>
    %cst_13 = arith.constant dense<0.000000e+00> : vector<32x128xf32>
    %16 = tpu.matmul %14, %15, %cst_13 {dimension_numbers = #tpu.dot_dimension_numbers<[1], [0], [0], [1], [0, 0, 1, 1], [], []>} : vector<32x64xbf16>, vector<64x128xbf16>, vector<32x128xf32> -> vector<32x128xf32>
    %17 = arith.addf %13, %16 : vector<32x128xf32>
    %cst_14 = arith.constant 0.000000e+00 : bf16
    %18 = vector.broadcast %cst_14 : bf16 to vector<2x1x128xbf16>
    %c0_15 = arith.constant 0 : index
    %c0_16 = arith.constant 0 : index
    %c0_17 = arith.constant 0 : index
    %19 = vector.load %arg14[%c0_15, %c0_16, %c0_17] : memref<2x18x128xbf16, #tpu.memory_space<vmem>>, vector<2x1x128xbf16>
    tpu.vector_store %arg14[%c0_15, %c0_16, %c0_17], %18 {strides = array<i32>} : memref<2x18x128xbf16, #tpu.memory_space<vmem>>, vector<2x1x128xbf16>,
    %c0_18 = arith.constant 0 : index
    %c17 = arith.constant 17 : index
    %c0_19 = arith.constant 0 : index
    %20 = vector.load %arg14[%c0_18, %c17, %c0_19] : memref<2x18x128xbf16, #tpu.memory_space<vmem>>, vector<2x1x128xbf16>
    tpu.vector_store %arg14[%c0_18, %c17, %c0_19], %18 {strides = array<i32>} : memref<2x18x128xbf16, #tpu.memory_space<vmem>>, vector<2x1x128xbf16>,
    %21 = vector.shape_cast %17 : vector<32x128xf32> to vector<2x16x128xf32>
    %22 = arith.truncf %21 : vector<2x16x128xf32> to vector<2x16x128xbf16>
    %c0_20 = arith.constant 0 : index
    %c1 = arith.constant 1 : index
    %c0_21 = arith.constant 0 : index
    %23 = vector.load %arg14[%c0_20, %c1, %c0_21] : memref<2x18x128xbf16, #tpu.memory_space<vmem>>, vector<2x16x128xbf16>
    tpu.vector_store %arg14[%c0_20, %c1, %c0_21], %22 {strides = array<i32>} : memref<2x18x128xbf16, #tpu.memory_space<vmem>>, vector<2x16x128xbf16>,
    %cst_22 = arith.constant 0.000000e+00 : f32
    %24 = vector.broadcast %cst_22 : f32 to vector<32x128xf32>
    %c0_23 = arith.constant 0 : index
    %c0_24 = arith.constant 0 : index
    %c0_25 = arith.constant 0 : index
    %25 = vector.load %arg14[%c0_23, %c0_24, %c0_25] : memref<2x18x128xbf16, #tpu.memory_space<vmem>>, vector<2x16x128xbf16>
    %26 = vector.shape_cast %25 : vector<2x16x128xbf16> to vector<32x128xbf16>
    %c0_26 = arith.constant 0 : index
    %c0_27 = arith.constant 0 : index
    %c0_28 = arith.constant 0 : index
    %27 = vector.load %arg5[%c0_26, %c0_27, %c0_28] : memref<3x128x128xbf16, #tpu.memory_space<vmem>>, vector<1x128x128xbf16>
    %28 = vector.shape_cast %27 : vector<1x128x128xbf16> to vector<128x128xbf16>
    %cst_29 = arith.constant dense<0.000000e+00> : vector<32x128xf32>
    %29 = tpu.matmul %26, %28, %cst_29 {dimension_numbers = #tpu.dot_dimension_numbers<[1], [0], [0], [1], [0, 0, 1, 1], [], []>} : vector<32x128xbf16>, vector<128x128xbf16>, vector<32x128xf32> -> vector<32x128xf32>
    %30 = arith.addf %24, %29 : vector<32x128xf32>
    %c0_30 = arith.constant 0 : index
    %c1_31 = arith.constant 1 : index
    %c0_32 = arith.constant 0 : index
    %31 = vector.load %arg14[%c0_30, %c1_31, %c0_32] : memref<2x18x128xbf16, #tpu.memory_space<vmem>>, vector<2x16x128xbf16>
    %32 = vector.shape_cast %31 : vector<2x16x128xbf16> to vector<32x128xbf16>
    %c1_33 = arith.constant 1 : index
    %c0_34 = arith.constant 0 : index
    %c0_35 = arith.constant 0 : index
    %33 = vector.load %arg5[%c1_33, %c0_34, %c0_35] : memref<3x128x128xbf16, #tpu.memory_space<vmem>>, vector<1x128x128xbf16>
    %34 = vector.shape_cast %33 : vector<1x128x128xbf16> to vector<128x128xbf16>
    %cst_36 = arith.constant dense<0.000000e+00> : vector<32x128xf32>
    %35 = tpu.matmul %32, %34, %cst_36 {dimension_numbers = #tpu.dot_dimension_numbers<[1], [0], [0], [1], [0, 0, 1, 1], [], []>} : vector<32x128xbf16>, vector<128x128xbf16>, vector<32x128xf32> -> vector<32x128xf32>
    %36 = arith.addf %30, %35 : vector<32x128xf32>
    %c0_37 = arith.constant 0 : index
    %c2 = arith.constant 2 : index
    %c0_38 = arith.constant 0 : index
    %37 = vector.load %arg14[%c0_37, %c2, %c0_38] : memref<2x18x128xbf16, #tpu.memory_space<vmem>>, vector<2x16x128xbf16>
    %38 = vector.shape_cast %37 : vector<2x16x128xbf16> to vector<32x128xbf16>
    %c2_39 = arith.constant 2 : index
    %c0_40 = arith.constant 0 : index
    %c0_41 = arith.constant 0 : index
    %39 = vector.load %arg5[%c2_39, %c0_40, %c0_41] : memref<3x128x128xbf16, #tpu.memory_space<vmem>>, vector<1x128x128xbf16>
    %40 = vector.shape_cast %39 : vector<1x128x128xbf16> to vector<128x128xbf16>
    %cst_42 = arith.constant dense<0.000000e+00> : vector<32x128xf32>
    %41 = tpu.matmul %38, %40, %cst_42 {dimension_numbers = #tpu.dot_dimension_numbers<[1], [0], [0], [1], [0, 0, 1, 1], [], []>} : vector<32x128xbf16>, vector<128x128xbf16>, vector<32x128xf32> -> vector<32x128xf32>
    %42 = arith.addf %36, %41 : vector<32x128xf32>
    %cst_43 = arith.constant dense<0.000000e+00> : vector<128xf32>
    %43 = vector.multi_reduction <add>, %42, %cst_43 [0] : vector<32x128xf32> to vector<128xf32>
    %44 = vector.shape_cast %43 : vector<128xf32> to vector<1x128xf32>
    %45 = arith.mulf %42, %42 : vector<32x128xf32>
    %cst_44 = arith.constant dense<0.000000e+00> : vector<128xf32>
    %46 = vector.multi_reduction <add>, %45, %cst_44 [0] : vector<32x128xf32> to vector<128xf32>
    %47 = vector.shape_cast %46 : vector<128xf32> to vector<1x128xf32>
    %48 = tpu.concatenate %44, %47 in 0 : vector<1x128xf32>, vector<1x128xf32> -> vector<2x128xf32>
    %c0_45 = arith.constant 0 : index
    %c0_46 = arith.constant 0 : index
    %49 = vector.load %arg11[%c0_45, %c0_46] : memref<128x8xf32, #tpu.memory_space<vmem>>, vector<128x8xf32>
    %cst_47 = arith.constant dense<0.000000e+00> : vector<2x8xf32>
    %50 = tpu.matmul %48, %49, %cst_47 {dimension_numbers = #tpu.dot_dimension_numbers<[1], [0], [0], [1], [0, 0, 1, 1], [], []>} : vector<2x128xf32>, vector<128x8xf32>, vector<2x8xf32> -> vector<2x8xf32>
    %cst_48 = arith.constant 0.001953125 : f32
    %51 = vector.broadcast %cst_48 : f32 to vector<2x8xf32>
    %52 = arith.mulf %50, %51 : vector<2x8xf32>
    %53 = vector.extract_strided_slice %52 {offsets = [0, 0], sizes = [1, 8], strides = [1, 1]} : vector<2x8xf32> to vector<1x8xf32>
    %54 = vector.extract_strided_slice %52 {offsets = [1, 0], sizes = [1, 8], strides = [1, 1]} : vector<2x8xf32> to vector<1x8xf32>
    %55 = arith.mulf %53, %53 : vector<1x8xf32>
    %56 = arith.subf %54, %55 : vector<1x8xf32>
    %cst_49 = arith.constant 0.000000e+00 : f32
    %57 = vector.broadcast %cst_49 : f32 to vector<1x8xf32>
    %58 = arith.maximumf %56, %57 : vector<1x8xf32>
    %c0_50 = arith.constant 0 : index
    %c0_51 = arith.constant 0 : index
    %59 = vector.load %arg6[%c0_50, %c0_51] : memref<1x8xf32, #tpu.memory_space<vmem>>, vector<1x8xf32>
    %cst_52 = arith.constant 9.99999974E-6 : f32
    %60 = vector.broadcast %cst_52 : f32 to vector<1x8xf32>
    %61 = arith.addf %58, %60 : vector<1x8xf32>
    %62 = math.rsqrt %61 : vector<1x8xf32>
    %63 = arith.mulf %59, %62 : vector<1x8xf32>
    %c0_53 = arith.constant 0 : index
    %c0_54 = arith.constant 0 : index
    %64 = vector.load %arg7[%c0_53, %c0_54] : memref<1x8xf32, #tpu.memory_space<vmem>>, vector<1x8xf32>
    %65 = arith.mulf %53, %63 : vector<1x8xf32>
    %66 = arith.subf %64, %65 : vector<1x8xf32>
    %67 = tpu.concatenate %63, %66 in 0 : vector<1x8xf32>, vector<1x8xf32> -> vector<2x8xf32>
    %c0_55 = arith.constant 0 : index
    %c0_56 = arith.constant 0 : index
    %68 = vector.load %arg12[%c0_55, %c0_56] : memref<8x128xf32, #tpu.memory_space<vmem>>, vector<8x128xf32>
    %cst_57 = arith.constant dense<0.000000e+00> : vector<2x128xf32>
    %69 = tpu.matmul %67, %68, %cst_57 {dimension_numbers = #tpu.dot_dimension_numbers<[1], [0], [0], [1], [0, 0, 1, 1], [], []>} : vector<2x8xf32>, vector<8x128xf32>, vector<2x128xf32> -> vector<2x128xf32>
    %70 = vector.extract_strided_slice %69 {offsets = [0, 0], sizes = [1, 128], strides = [1, 1]} : vector<2x128xf32> to vector<1x128xf32>
    %71 = vector.broadcast %70 : vector<1x128xf32> to vector<32x128xf32>
    %72 = arith.mulf %42, %71 : vector<32x128xf32>
    %73 = vector.extract_strided_slice %69 {offsets = [1, 0], sizes = [1, 128], strides = [1, 1]} : vector<2x128xf32> to vector<1x128xf32>
    %74 = vector.broadcast %73 : vector<1x128xf32> to vector<32x128xf32>
    %75 = arith.addf %72, %74 : vector<32x128xf32>
    %cst_58 = arith.constant 0.000000e+00 : f32
    %76 = vector.broadcast %cst_58 : f32 to vector<32x128xf32>
    %77 = arith.maximumf %75, %76 : vector<32x128xf32>
    %cst_59 = arith.constant 0.000000e+00 : bf16
    %78 = vector.broadcast %cst_59 : bf16 to vector<2x1x128xbf16>
    %c0_60 = arith.constant 0 : index
    %c0_61 = arith.constant 0 : index
    %c0_62 = arith.constant 0 : index
    %79 = vector.load %arg14[%c0_60, %c0_61, %c0_62] : memref<2x18x128xbf16, #tpu.memory_space<vmem>>, vector<2x1x128xbf16>
    tpu.vector_store %arg14[%c0_60, %c0_61, %c0_62], %78 {strides = array<i32>} : memref<2x18x128xbf16, #tpu.memory_space<vmem>>, vector<2x1x128xbf16>,
    %c0_63 = arith.constant 0 : index
    %c17_64 = arith.constant 17 : index
    %c0_65 = arith.constant 0 : index
    %80 = vector.load %arg14[%c0_63, %c17_64, %c0_65] : memref<2x18x128xbf16, #tpu.memory_space<vmem>>, vector<2x1x128xbf16>
    tpu.vector_store %arg14[%c0_63, %c17_64, %c0_65], %78 {strides = array<i32>} : memref<2x18x128xbf16, #tpu.memory_space<vmem>>, vector<2x1x128xbf16>,
    %81 = vector.shape_cast %77 : vector<32x128xf32> to vector<2x16x128xf32>
    %82 = arith.truncf %81 : vector<2x16x128xf32> to vector<2x16x128xbf16>
    %c0_66 = arith.constant 0 : index
    %c1_67 = arith.constant 1 : index
    %c0_68 = arith.constant 0 : index
    %83 = vector.load %arg14[%c0_66, %c1_67, %c0_68] : memref<2x18x128xbf16, #tpu.memory_space<vmem>>, vector<2x16x128xbf16>
    tpu.vector_store %arg14[%c0_66, %c1_67, %c0_68], %82 {strides = array<i32>} : memref<2x18x128xbf16, #tpu.memory_space<vmem>>, vector<2x16x128xbf16>,
    %cst_69 = arith.constant 0.000000e+00 : f32
    %84 = vector.broadcast %cst_69 : f32 to vector<32x128xf32>
    %c0_70 = arith.constant 0 : index
    %c0_71 = arith.constant 0 : index
    %c0_72 = arith.constant 0 : index
    %85 = vector.load %arg14[%c0_70, %c0_71, %c0_72] : memref<2x18x128xbf16, #tpu.memory_space<vmem>>, vector<2x16x128xbf16>
    %86 = vector.shape_cast %85 : vector<2x16x128xbf16> to vector<32x128xbf16>
    %c0_73 = arith.constant 0 : index
    %c0_74 = arith.constant 0 : index
    %c0_75 = arith.constant 0 : index
    %87 = vector.load %arg8[%c0_73, %c0_74, %c0_75] : memref<3x128x128xbf16, #tpu.memory_space<vmem>>, vector<1x128x128xbf16>
    %88 = vector.shape_cast %87 : vector<1x128x128xbf16> to vector<128x128xbf16>
    %cst_76 = arith.constant dense<0.000000e+00> : vector<32x128xf32>
    %89 = tpu.matmul %86, %88, %cst_76 {dimension_numbers = #tpu.dot_dimension_numbers<[1], [0], [0], [1], [0, 0, 1, 1], [], []>} : vector<32x128xbf16>, vector<128x128xbf16>, vector<32x128xf32> -> vector<32x128xf32>
    %90 = arith.addf %84, %89 : vector<32x128xf32>
    %c0_77 = arith.constant 0 : index
    %c1_78 = arith.constant 1 : index
    %c0_79 = arith.constant 0 : index
    %91 = vector.load %arg14[%c0_77, %c1_78, %c0_79] : memref<2x18x128xbf16, #tpu.memory_space<vmem>>, vector<2x16x128xbf16>
    %92 = vector.shape_cast %91 : vector<2x16x128xbf16> to vector<32x128xbf16>
    %c1_80 = arith.constant 1 : index
    %c0_81 = arith.constant 0 : index
    %c0_82 = arith.constant 0 : index
    %93 = vector.load %arg8[%c1_80, %c0_81, %c0_82] : memref<3x128x128xbf16, #tpu.memory_space<vmem>>, vector<1x128x128xbf16>
    %94 = vector.shape_cast %93 : vector<1x128x128xbf16> to vector<128x128xbf16>
    %cst_83 = arith.constant dense<0.000000e+00> : vector<32x128xf32>
    %95 = tpu.matmul %92, %94, %cst_83 {dimension_numbers = #tpu.dot_dimension_numbers<[1], [0], [0], [1], [0, 0, 1, 1], [], []>} : vector<32x128xbf16>, vector<128x128xbf16>, vector<32x128xf32> -> vector<32x128xf32>
    %96 = arith.addf %90, %95 : vector<32x128xf32>
    %c0_84 = arith.constant 0 : index
    %c2_85 = arith.constant 2 : index
    %c0_86 = arith.constant 0 : index
    %97 = vector.load %arg14[%c0_84, %c2_85, %c0_86] : memref<2x18x128xbf16, #tpu.memory_space<vmem>>, vector<2x16x128xbf16>
    %98 = vector.shape_cast %97 : vector<2x16x128xbf16> to vector<32x128xbf16>
    %c2_87 = arith.constant 2 : index
    %c0_88 = arith.constant 0 : index
    %c0_89 = arith.constant 0 : index
    %99 = vector.load %arg8[%c2_87, %c0_88, %c0_89] : memref<3x128x128xbf16, #tpu.memory_space<vmem>>, vector<1x128x128xbf16>
    %100 = vector.shape_cast %99 : vector<1x128x128xbf16> to vector<128x128xbf16>
    %cst_90 = arith.constant dense<0.000000e+00> : vector<32x128xf32>
    %101 = tpu.matmul %98, %100, %cst_90 {dimension_numbers = #tpu.dot_dimension_numbers<[1], [0], [0], [1], [0, 0, 1, 1], [], []>} : vector<32x128xbf16>, vector<128x128xbf16>, vector<32x128xf32> -> vector<32x128xf32>
    %102 = arith.addf %96, %101 : vector<32x128xf32>
    %cst_91 = arith.constant dense<0.000000e+00> : vector<128xf32>
    %103 = vector.multi_reduction <add>, %102, %cst_91 [0] : vector<32x128xf32> to vector<128xf32>
    %104 = vector.shape_cast %103 : vector<128xf32> to vector<1x128xf32>
    %105 = arith.mulf %102, %102 : vector<32x128xf32>
    %cst_92 = arith.constant dense<0.000000e+00> : vector<128xf32>
    %106 = vector.multi_reduction <add>, %105, %cst_92 [0] : vector<32x128xf32> to vector<128xf32>
    %107 = vector.shape_cast %106 : vector<128xf32> to vector<1x128xf32>
    %108 = tpu.concatenate %104, %107 in 0 : vector<1x128xf32>, vector<1x128xf32> -> vector<2x128xf32>
    %c0_93 = arith.constant 0 : index
    %c0_94 = arith.constant 0 : index
    %109 = vector.load %arg11[%c0_93, %c0_94] : memref<128x8xf32, #tpu.memory_space<vmem>>, vector<128x8xf32>
    %cst_95 = arith.constant dense<0.000000e+00> : vector<2x8xf32>
    %110 = tpu.matmul %108, %109, %cst_95 {dimension_numbers = #tpu.dot_dimension_numbers<[1], [0], [0], [1], [0, 0, 1, 1], [], []>} : vector<2x128xf32>, vector<128x8xf32>, vector<2x8xf32> -> vector<2x8xf32>
    %cst_96 = arith.constant 0.001953125 : f32
    %111 = vector.broadcast %cst_96 : f32 to vector<2x8xf32>
    %112 = arith.mulf %110, %111 : vector<2x8xf32>
    %113 = vector.extract_strided_slice %112 {offsets = [0, 0], sizes = [1, 8], strides = [1, 1]} : vector<2x8xf32> to vector<1x8xf32>
    %114 = vector.extract_strided_slice %112 {offsets = [1, 0], sizes = [1, 8], strides = [1, 1]} : vector<2x8xf32> to vector<1x8xf32>
    %115 = arith.mulf %113, %113 : vector<1x8xf32>
    %116 = arith.subf %114, %115 : vector<1x8xf32>
    %cst_97 = arith.constant 0.000000e+00 : f32
    %117 = vector.broadcast %cst_97 : f32 to vector<1x8xf32>
    %118 = arith.maximumf %116, %117 : vector<1x8xf32>
    %c0_98 = arith.constant 0 : index
    %c0_99 = arith.constant 0 : index
    %119 = vector.load %arg9[%c0_98, %c0_99] : memref<1x8xf32, #tpu.memory_space<vmem>>, vector<1x8xf32>
    %cst_100 = arith.constant 9.99999974E-6 : f32
    %120 = vector.broadcast %cst_100 : f32 to vector<1x8xf32>
    %121 = arith.addf %118, %120 : vector<1x8xf32>
    %122 = math.rsqrt %121 : vector<1x8xf32>
    %123 = arith.mulf %119, %122 : vector<1x8xf32>
    %c0_101 = arith.constant 0 : index
    %c0_102 = arith.constant 0 : index
    %124 = vector.load %arg10[%c0_101, %c0_102] : memref<1x8xf32, #tpu.memory_space<vmem>>, vector<1x8xf32>
    %125 = arith.mulf %113, %123 : vector<1x8xf32>
    %126 = arith.subf %124, %125 : vector<1x8xf32>
    %127 = tpu.concatenate %123, %126 in 0 : vector<1x8xf32>, vector<1x8xf32> -> vector<2x8xf32>
    %c0_103 = arith.constant 0 : index
    %c0_104 = arith.constant 0 : index
    %128 = vector.load %arg12[%c0_103, %c0_104] : memref<8x128xf32, #tpu.memory_space<vmem>>, vector<8x128xf32>
    %cst_105 = arith.constant dense<0.000000e+00> : vector<2x128xf32>
    %129 = tpu.matmul %127, %128, %cst_105 {dimension_numbers = #tpu.dot_dimension_numbers<[1], [0], [0], [1], [0, 0, 1, 1], [], []>} : vector<2x8xf32>, vector<8x128xf32>, vector<2x128xf32> -> vector<2x128xf32>
    %130 = vector.extract_strided_slice %129 {offsets = [0, 0], sizes = [1, 128], strides = [1, 1]} : vector<2x128xf32> to vector<1x128xf32>
    %131 = vector.broadcast %130 : vector<1x128xf32> to vector<32x128xf32>
    %132 = arith.mulf %102, %131 : vector<32x128xf32>
    %133 = vector.extract_strided_slice %129 {offsets = [1, 0], sizes = [1, 128], strides = [1, 1]} : vector<2x128xf32> to vector<1x128xf32>
    %134 = vector.broadcast %133 : vector<1x128xf32> to vector<32x128xf32>
    %135 = arith.addf %132, %134 : vector<32x128xf32>
    %cst_106 = arith.constant 0.000000e+00 : f32
    %136 = vector.broadcast %cst_106 : f32 to vector<32x128xf32>
    %137 = arith.maximumf %135, %136 : vector<32x128xf32>
    %c0_107 = arith.constant 0 : index
    %c0_108 = arith.constant 0 : index
    %138 = vector.load %arg13[%c0_107, %c0_108] : memref<32x128xf32, #tpu.memory_space<vmem>>, vector<32x128xf32>
    tpu.vector_store %arg13[%c0_107, %c0_108], %137 {strides = array<i32>} : memref<32x128xf32, #tpu.memory_space<vmem>>, vector<32x128xf32>,
    return
  }
}

</mosaic_0001>

<bundles_post_ra>
// kernel: forward.1
= control target key start
LH: loop header
LB: loop body
LE: loop exit
PB: predicated region body
PF: predicated region fallthrough
CT: control target
= control target key end

     0   :  { %v2513_v0 = vmov 0.0   ;;  %vm2514_vm0 = vmmov 0   ;;  %vm68_vm1 = vcmask 261120   ;;  %vm330_vm2 = vsmask.f32 7938  ;;  %s3113_s2 = inlined_call_operand.vmem [shape: bf16[32,128], index: 2, kind: input, shape index: {}]   ;;  %s3114_s4 = inlined_call_operand.vmem [shape: bf16[64,128], index: 4, kind: input, shape index: {}]   ;;  %s3115_s0 = inlined_call_operand.vmem [shape: bf16[16,32], index: 0, kind: input, shape index: {}]   ;;  %s3116_s1 = inlined_call_operand.vmem [shape: bf16[32,64], index: 1, kind: input, shape index: {}]   ;;  %s3117_s3 = inlined_call_operand.vmem [shape: bf16[16,8], index: 3, kind: input, shape index: {}]   ;;  %s3118_s5 = inlined_call_operand.vmem [shape: bf16[3,128,128], index: 5, kind: input, shape index: {}]   ;;  %s3119_s11 = inlined_call_operand.vmem [shape: f32[128,8], index: 11, kind: input, shape index: {}]   ;;  %s3120_s12 = inlined_call_operand.vmem [shape: f32[8,128], index: 12, kind: input, shape index: {}]   ;;  %s3121_s6 = inlined_call_operand.vmem [shape: f32[1,8], index: 6, kind: input, shape index: {}, may-alias: {6,9}]   ;;  %s3122_s7 = inlined_call_operand.vmem [shape: f32[1,8], index: 7, kind: input, shape index: {}, may-alias: {7,10}]   ;;  %s3123_s8 = inlined_call_operand.vmem [shape: bf16[3,128,128], index: 8, kind: input, shape index: {}]   ;;  %s3124_s9 = inlined_call_operand.vmem [shape: f32[1,8], index: 9, kind: input, shape index: {}, may-alias: {6,9}]   ;;  %s3125_s10 = inlined_call_operand.vmem [shape: f32[1,8], index: 10, kind: input, shape index: {}, may-alias: {7,10}]   ;;  %s3126_s13 = inlined_call_operand.vmem [shape: f32[32,128], index: 13, kind: output, shape index: {}]  }
   0x1   :  { %2149 = vmatprep.subr.bf16.mxu1 %v2513_v0  ;;  %v2449_v1 = vld [vmem:[%s3113_s2] sm:$0xff]   ;;  %2153 = vmatprep.mubr.msk.bf16.mxu1 %vm2514_vm0, %v2513_v0  ;;  %v2450_v2 = vld [vmem:[%s3113_s2 + $0x8] sm:$0xff]   ;;  %v2454_v6 = vld [vmem:[%s3114_s4 + $0x10] sm:$0xff]   ;;  %vm321_vm3 = vcmask 1040384   ;;  %vm261_vm4 = vcmask 523264   ;;  %vm126_vm6 = vcmask 1043456  }
   0x2   :  { %2150 = vmatpush3.bf16.msra.mxu1 %v2449_v1  ;;  %v2452_v3 = vld [vmem:[%s3114_s4] sm:$0xff]   ;;  %v2453_v4 = vld [vmem:[%s3114_s4 + $0x8] sm:$0xff]   ;;  %v2455_v7 = vld [vmem:[%s3114_s4 + $0x18] sm:$0xff]   ;;  %vm122_vm7 = vcmask 64512   ;;  %vm322_vm8 = vsmask.f32 256 }
   0x3   :  { %2151 = vmatprep.subr.bf16.mxu1 %v2513_v0  ;;  %v2451_v5 = vld [vmem:[%s3115_s0] sm:$0xff]   ;;  %2169 = vmatprep.subr.bf16.mxu0 %v2452_v3  ;;  %v332_v9 = vld [vmem:[#allocation2 + $0x8] sm:$0x1]  ;;  %v335_v10 = vld [vmem:[#allocation2 + $0x14] sm:$0x1]  ;;  %v2515_v42 = vmov 0.0|0.0  }
   0x4   :  { %2170 = vmatpush3.bf16.msra.mxu0 %v2452_v3  ;;  %v2456_v8 = vld [vmem:[%s3116_s1] sm:$0xff]   ;;  %vm2620_vm5 = vmand %vm321_vm3, %vm330_vm2  ;;  %v2457_v14 = vld [vmem:[%s3116_s1 + $0x8] sm:$0xff]   ;;  %vm350_vm10 = vsmask.f32 4368  ;;  %vm430_vm13 = vsmask.f32 3328 }
   0x5   :  { %2171 = vmatprep.subr.bf16.mxu0 %v2453_v4  ;;  %2177 = vmatprep.mubr.msk.bf16.mxu0 %vm261_vm4, %v2456_v8  ;;  %v333_v12 = vsel %vm2620_vm5, 0, %v332_v9  ;;  %v336_v13 = vsel %vm2620_vm5, 0, %v335_v10  ;;  %v2458_v22 = vld [vmem:[%s3117_s3] sm:$0xff]   ;;  %vm2645_vm9 = vmand %vm321_vm3, %vm322_vm8  ;;  %v327_v32 = vld [vmem:[#allocation2 + $0xc] sm:$0x1] }
   0x6   :  { %2152 = vmatpush3.bf16.msra.mxu1 %v2450_v2  ;;  %334 = vst [vmem:[#allocation2 + $0x8] sm:$0x1] %v333_v12  ;;  %337 = vst [vmem:[#allocation2 + $0x14] sm:$0x1] %v336_v13  ;;  %v324_v25 = vld [vmem:[#allocation2] sm:$0x1] }
   0x7   :  { %2157 = vmatprep.subr.bf16.mxu1 %v2513_v0  ;;  %v325_v27 = vsel %vm2645_vm9, 0, %v324_v25  ;;  %v2459_v31 = vld [vmem:[%s3118_s5 + $0x40] sm:$0xff]   ;;  %v328_v33 = vsel %vm2645_vm9, 0, %v327_v32  ;;  %v2460_v34 = vld [vmem:[%s3118_s5 + $0x48] sm:$0xff]   ;;  %v2461_v35 = vld [vmem:[%s3118_s5 + $0x50] sm:$0xff]  }
   0x8   :  { %2172 = vmatpush3.bf16.msra.mxu0 %v2453_v4  ;;  %326 = vst [vmem:[#allocation2] sm:$0x1] %v325_v27  ;;  %329 = vst [vmem:[#allocation2 + $0xc] sm:$0x1] %v328_v33  ;;  %v2462_v36 = vld [vmem:[%s3118_s5 + $0x58] sm:$0xff]   ;;  %v2463_v37 = vld [vmem:[%s3118_s5 + $0x60] sm:$0xff]  }
   0x9   :  { %2154 = vmatmul.mubr.msk.bf16.vlgmr.msra.gmra.mrb[0].mxu1 %vm68_vm1, %v2451_v5  ;;  %2173 = vmatprep.subr.bf16.mxu0 %v2454_v6  ;;  %v2464_v38 = vld [vmem:[%s3118_s5 + $0x68] sm:$0xff]   ;;  %v2465_v39 = vld [vmem:[%s3118_s5 + $0x70] sm:$0xff]   ;;  %v2466_v40 = vld [vmem:[%s3118_s5 + $0x78] sm:$0xff]   ;;  %vm431_vm14 = vsmask.f32 7440  ;;  %vm718_vm1 = vcmask 1042432  }
   0xa   :  { %2159 = vmatprep.mubr.msk.bf16.mxu1 %vm2514_vm0, %v2513_v0  ;;  %v2684_v41 = vld [vmem:[%s3118_s5] sm:$0xff]   ;;  %v886_v44 = vld [vmem:[%s3119_s11 + $0x8] sm:$0xff]  ;;  %v887_v45 = vld [vmem:[%s3119_s11 + $0x10] sm:$0xff] }
   0xb   :  { %v885_v43 = vld [vmem:[%s3119_s11] sm:$0xff]  ;;  %v888_v47 = vld [vmem:[%s3119_s11 + $0x18] sm:$0xff]  ;;  %vm2710_vm11 = vmand %vm126_vm6, %vm330_vm2  ;;  %vm719_vm2 = vcmask 1046532  }
   0xc   :  { %2174 = vmatpush3.bf16.msra.mxu0 %v2454_v6  ;;  %v2697_v46 = vpack.c.bf16 %v886_v44, %v885_v43  ;;  %v2703_v48 = vpack.c.bf16 %v888_v47, %v887_v45  ;;  %vm2716_vm12 = vmor %vm322_vm8, %vm350_vm10  ;;  %v2468_v11 = vld [vmem:[%s3118_s5 + $0x8] sm:$0xff]  }
   0xd   :  { %2175 = vmatprep.subr.bf16.mxu0 %v2455_v7  ;;  %v398_v8 = vld [vmem:[#allocation2 + $0x8] sm:$0x1]  ;;  %vm2750_vm15 = vmor %vm430_vm13, %vm431_vm14 }
   0xf   :  { %v394_v62 = vld [vmem:[#allocation2] sm:$0xf] }
  0x10   :  { %2176 = vmatpush3.bf16.msra.mxu0 %v2455_v7 }
  0x11   :  { %2381 = vmatprep.subr.bf16.mxu0 %v2515_v42 }
  0x13   :  { %2178 = vmatmul.mubr.msk.bf16.vlgmr.msra.gmra.mrb[0].mxu0 %vm261_vm4, %v2457_v14  ;;  %vm2804_vm4 = vmor %vm718_vm1, %vm719_vm2 }
  0x14   :  { %2273 = vmatprep.mubr.msk.f32.mxu0 %vm2514_vm0, %v2513_v0  ;;  %2383 = vmatpush3.bf16.msra.mxu0 %v2697_v46 }
  0x15   :  { %2384 = vmatprep.subr.bf16.mxu0 %v2515_v42 }
  0x18   :  { %2386 = vmatpush3.bf16.msra.mxu0 %v2703_v48 }
  0x19   :  { %2387 = vmatprep.subr.bf16.mxu0 %v2515_v42 }
  0xdc   :  { %v106_v15 = vpop.f32.mrb[0].mxu1 }
  0xdd   :  { %v113_v16 = vpack.c.bf16 %v106_v15, %v106_v15  ;;  %v2155_v17 = vpop.f32.mrb[1].mxu1 }
  0xde   :  { %v109_v18 = vpop.f32.mrb[2].mxu1 }
  0xdf   :  { %v128_v19 = vsel %vm126_vm6, %v113_v16, 0  ;;  %v114_v20 = vpack.c.bf16 %v109_v18, %v109_v18  ;;  %v2156_v21 = vpop.f32.mrb[3].mxu1 }
  0xe0   :  { %2158 = vmatpush3.bf16.msra.mxu1 %v128_v19 }
  0xe1   :  { %2163 = vmatprep.subr.bf16.mxu1 %v2513_v0  ;;  %v172_v23 = vsel %vm126_vm6, %v114_v20, 0 }
  0xe3   :  { %2160 = vmatmul.mubr.msk.bf16.vlgmr.msra.gmra.mrb[4].mxu1 %vm122_vm7, %v2458_v22 }
  0xe4   :  { %2164 = vmatpush3.bf16.msra.mxu1 %v172_v23  ;;  %2165 = vmatprep.mubr.msk.bf16.mxu1 %vm2514_vm0, %v2513_v0  ;;  %v401_v23 = vld [vmem:[#allocation2 + $0xc] sm:$0xf] }
  0xe5   :  { %2181 = vmatprep.subr.bf16.mxu1 %v2459_v31 }
  0xe6   :  { %v2649_v26 = vpop.f32.mrb[0].mxu0 }
  0xe7   :  { %v302_v28 = vpop.f32.mrb[1].mxu0 }
  0xe8   :  { %v2653_v29 = vpop.f32.mrb[2].mxu0 }
  0xe9   :  { %v305_v30 = vpop.f32.mrb[3].mxu0 }
  0xeb   :  { %2166 = vmatmul.mubr.msk.bf16.vlgmr.msra.gmra.mrb[8].mxu1 %vm122_vm7, %v2458_v22 }
  0xec   :  { %2182 = vmatpush3.bf16.msra.mxu1 %v2459_v31 }
  0xed   :  { %2183 = vmatprep.subr.bf16.mxu1 %v2460_v34 }
  0xf0   :  { %2184 = vmatpush3.bf16.msra.mxu1 %v2460_v34 }
  0xf1   :  { %2185 = vmatprep.subr.bf16.mxu1 %v2461_v35 }
  0xf4   :  { %2186 = vmatpush3.bf16.msra.mxu1 %v2461_v35 }
  0xf5   :  { %2187 = vmatprep.subr.bf16.mxu1 %v2462_v36 }
  0xf8   :  { %2188 = vmatpush3.bf16.msra.mxu1 %v2462_v36 }
  0xf9   :  { %2189 = vmatprep.subr.bf16.mxu1 %v2463_v37 }
  0xfc   :  { %2190 = vmatpush3.bf16.msra.mxu1 %v2463_v37 }
  0xfd   :  { %2191 = vmatprep.subr.bf16.mxu1 %v2464_v38 }
 0x100   :  { %2192 = vmatpush3.bf16.msra.mxu1 %v2464_v38 }
 0x101   :  { %2193 = vmatprep.subr.bf16.mxu1 %v2465_v39 }
 0x104   :  { %2194 = vmatpush3.bf16.msra.mxu1 %v2465_v39 }
 0x105   :  { %2195 = vmatprep.subr.bf16.mxu1 %v2466_v40 }
 0x108   :  { %2196 = vmatpush3.bf16.msra.mxu1 %v2466_v40 }
 0x109   :  { %2201 = vmatprep.subr.bf16.mxu1 %v2684_v41 }
 0x1b6   :  { %v164_v49 = vpop.f32.mrb[4].mxu1 }
 0x1b7   :  { %v317_v50 = vadd.f32 %v302_v28, %v164_v49  ;;  %v2161_v51 = vpop.f32.mrb[5].mxu1 }
 0x1b8   :  { %v167_v52 = vpop.f32.mrb[6].mxu1 }
 0x1b9   :  { %v2030_v53 = vpack.c.bf16 %v317_v50, %v317_v50  ;;  %v318_v54 = vadd.f32 %v305_v30, %v167_v52  ;;  %v2162_v55 = vpop.f32.mrb[7].mxu1  ;;  %v405_v30 = vld [vmem:[#allocation2 + $0x14] sm:$0x1] }
 0x1bb   :  { %v353_v56 = vshrl.u32 %v2030_v53, 16  ;;  %v2031_v57 = vpack.c.bf16 %v318_v54, %v318_v54  ;;  %v356_v59 = vshll.u32 %v2030_v53, 16 }
 0x1bd   :  { %v355_v58 = vrot.slane %v353_v56, 7  ;;  %v361_v60 = vshrl.u32 %v2031_v57, 16  ;;  %v364_v3 = vshll.u32 %v2031_v57, 16 }
 0x1be   :  { %v208_v63 = vpop.f32.mrb[8].mxu1 }
 0x1bf   :  { %v358_v1 = vor.u32 %v356_v59, %v355_v58  ;;  %v363_v2 = vrot.slane %v361_v60, 7  ;;  %v319_v4 = vadd.f32 %v2649_v26, %v208_v63  ;;  %v2167_v5 = vpop.f32.mrb[9].mxu1  ;;  %v359_v6 = vrot.slane %v355_v58, 4 }
 0x1c0   :  { %v211_v9 = vpop.f32.mrb[10].mxu1 }
 0x1c1   :  { %v395_v10 = vsel %vm2710_vm11, %v358_v1, %v394_v62  ;;  %v366_v12 = vor.u32 %v364_v3, %v363_v2  ;;  %v368_v13 = vrot.slane %v363_v2, 4  ;;  %v2032_v14 = vpack.c.bf16 %v319_v4, %v319_v4  ;;  %v2168_v15 = vpop.f32.mrb[11].mxu1  ;;  %v2494_v62 = vld [vmem:[%s3123_s8 + $0x10] sm:$0xff]  }
 0x1c2   :  { %396 = vst [vmem:[#allocation2] sm:$0xf] %v395_v10  ;;  %v320_v16 = vadd.f32 %v2653_v29, %v211_v9 }
 0x1c3   :  { %v367_v17 = vsel %vm2716_vm12, %v359_v6, %v366_v12  ;;  %v399_v18 = vsel %vm2645_vm9, %v368_v13, %v398_v8  ;;  %v370_v19 = vshrl.u32 %v2032_v14, 16  ;;  %v373_v22 = vshll.u32 %v2032_v14, 16 }
 0x1c4   :  { %397 = vst [vmem:[#allocation2 + $0x4] sm:$0xf] %v367_v17  ;;  %400 = vst [vmem:[#allocation2 + $0x8] sm:$0x1] %v399_v18  ;;  %v2033_v20 = vpack.c.bf16 %v320_v16, %v320_v16 }
 0x1c5   :  { %v372_v21 = vrot.slane %v370_v19, 7 }
 0x1c6   :  { %v378_v25 = vshrl.u32 %v2033_v20, 16  ;;  %v381_v28 = vshll.u32 %v2033_v20, 16 }
 0x1c7   :  { %v375_v26 = vor.u32 %v373_v22, %v372_v21  ;;  %v376_v31 = vrot.slane %v372_v21, 4 }
 0x1c8   :  { %v380_v27 = vrot.slane %v378_v25, 7 }
 0x1c9   :  { %v402_v29 = vsel %vm2710_vm11, %v375_v26, %v401_v23  ;;  %v2729_v32 = vld [vmem:[#allocation2] sm:$0xf] }
 0x1ca   :  { %v1103_v33 = vld [vmem:[#allocation2] sm:$0x1]  ;;  %403 = vst [vmem:[#allocation2 + $0xc] sm:$0xf] %v402_v29  ;;  %v383_v34 = vor.u32 %v381_v28, %v380_v27  ;;  %v385_v35 = vrot.slane %v380_v27, 4  ;;  %v434_v36 = vshrl.u32 %v2729_v32, 16 }
 0x1cb   :  { %v437_v37 = vshll.u32 %v2729_v32, 16  ;;  %v2733_v38 = vld [vmem:[#allocation2 + $0x4] sm:$0xf]  ;;  %v2735_v39 = vld [vmem:[#allocation2 + $0x8] sm:$0x1]  ;;  %v1104_v40 = vsel %vm2645_vm9, 0, %v1103_v33 }
 0x1cc   :  { %v384_v43 = vsel %vm2716_vm12, %v376_v31, %v383_v34  ;;  %v406_v44 = vsel %vm2645_vm9, %v385_v35, %v405_v30  ;;  %v436_v45 = vrot.slane %v434_v36, 4  ;;  %1105 = vst [vmem:[#allocation2] sm:$0x1] %v1104_v40  ;;  %v1109_v49 = vld [vmem:[#allocation2 + $0x8] sm:$0x1]  ;;  %v443_v50 = vshll.u32 %v2733_v38, 16 }
 0x1cd   :  { %v439_v47 = vrot.slane %v437_v37, 5  ;;  %404 = vst [vmem:[#allocation2 + $0x10] sm:$0xf] %v384_v43  ;;  %407 = vst [vmem:[#allocation2 + $0x14] sm:$0x1] %v406_v44  ;;  %v447_v51 = vshrl.u32 %v2733_v38, 16  ;;  %v1922_v31 = vcombine.low %v2729_v32, %v2733_v38 }
 0x1ce   :  { %v1110_v52 = vsel %vm2620_vm5, 0, %v1109_v49  ;;  %v445_v54 = vrot.slane %v443_v50, 5  ;;  %v453_v56 = vshll.u32 %v2735_v39, 16  ;;  %v2469_v29 = vld [vmem:[%s3118_s5 + $0x10] sm:$0xff]   ;;  %v2470_v33 = vld [vmem:[%s3118_s5 + $0x18] sm:$0xff]   ;;  %v2471_v32 = vld [vmem:[%s3118_s5 + $0x20] sm:$0xff]  }
 0x1cf   :  { %v440_v53 = vor.u32 %v439_v47, %v436_v45  ;;  %1111 = vst [vmem:[#allocation2 + $0x8] sm:$0x1] %v1110_v52  ;;  %v449_v55 = vrot.slane %v447_v51, 4  ;;  %v2473_v34 = vld [vmem:[%s3118_s5 + $0x30] sm:$0xff]   ;;  %v723_v35 = vrot.slane %v2733_v38, 5  ;;  %v2474_v36 = vld [vmem:[%s3118_s5 + $0x38] sm:$0xff]  }
 0x1d0   :  { %v455_v4 = vrot.slane %v453_v56, 5  ;;  %v712_v40 = vld [vmem:[#allocation2] sm:$0xe]  ;;  %v726_v44 = vrot.slane %v2735_v39, 5  ;;  %v2476_v39 = vld [vmem:[%s3118_s5 + $0x88] sm:$0xff]   ;;  %v2477_v52 = vld [vmem:[%s3118_s5 + $0x90] sm:$0xff]  }
 0x1d1   :  { %v441_v57 = vrot.slane %v440_v53, 4  ;;  %v450_v58 = vor.u32 %v449_v55, %v445_v54  ;;  %v2748_v59 = vld [vmem:[#allocation2 + $0xc] sm:$0xf]  ;;  %v725_v37 = vrot.slane %v723_v35, 4  ;;  %v2475_v43 = vld [vmem:[%s3118_s5 + $0x80] sm:$0xff]   ;;  %v1932_v45 = vrot.slane %v712_v40, 9 }
 0x1d2   :  { %v1106_v60 = vld [vmem:[#allocation2 + $0xc] sm:$0x1]  ;;  %v458_v63 = vshrl.u32 %v2748_v59, 16  ;;  %v461_v1 = vshll.u32 %v2748_v59, 16  ;;  %v2478_v53 = vld [vmem:[%s3118_s5 + $0x98] sm:$0xff]   ;;  %v2481_v56 = vld [vmem:[%s3118_s5 + $0xb0] sm:$0xff]  }
 0x1d3   :  { %v1107_v2 = vsel %vm2645_vm9, 0, %v1106_v60  ;;  %v451_v3 = vrot.slane %v450_v58, 4  ;;  %v446_v10 = vsel %vm2750_vm15, %v441_v57, %v445_v54  ;;  %v727_v47 = vsel %vm2804_vm4, %v725_v37, %v726_v44  ;;  %v2479_v54 = vld [vmem:[%s3118_s5 + $0xa0] sm:$0xff]   ;;  %v2480_v55 = vld [vmem:[%s3118_s5 + $0xa8] sm:$0xff]   ;;  %v2482_v58 = vld [vmem:[%s3118_s5 + $0xb8] sm:$0xff]  }
 0x1d4   :  { %1108 = vst [vmem:[#allocation2 + $0xc] sm:$0x1] %v1107_v2  ;;  %v2758_v5 = vld [vmem:[#allocation2 + $0x10] sm:$0xf]  ;;  %v2760_v6 = vld [vmem:[#allocation2 + $0x14] sm:$0x1]  ;;  %v724_v50 = vsel %vm2804_vm4, %v1932_v45, %v723_v35 }
 0x1d5   :  { %v460_v8 = vrot.slane %v458_v63, 4  ;;  %v463_v9 = vrot.slane %v461_v1, 5  ;;  %v456_v12 = vsel %vm2750_vm15, %v451_v3, %v455_v4  ;;  %v467_v13 = vshll.u32 %v2758_v5, 16  ;;  %v1112_v15 = vld [vmem:[#allocation2 + $0x14] sm:$0x1]  ;;  %v2504_v38 = vld [vmem:[%s3123_s8 + $0x98] sm:$0xff]  }
 0x1d6   :  { %v471_v14 = vshrl.u32 %v2758_v5, 16  ;;  %v1912_v16 = vcombine.low %v446_v10, %v456_v12  ;;  %v1113_v18 = vsel %vm2620_vm5, 0, %v1112_v15  ;;  %v477_v21 = vshll.u32 %v2760_v6, 16  ;;  %v713_v60 = vld [vmem:[#allocation2 + $0xc] sm:$0xe]  ;;  %v893_v10 = vld [vmem:[%s3119_s11 + $0x40] sm:$0xff] }
 0x1d7   :  { %v464_v17 = vor.u32 %v463_v9, %v460_v8  ;;  %v469_v19 = vrot.slane %v467_v13, 5  ;;  %1114 = vst [vmem:[#allocation2 + $0x14] sm:$0x1] %v1113_v18  ;;  %v1923_v49 = vcombine.low %v2748_v59, %v2758_v5  ;;  %v1950_v51 = vcombine.low %v724_v50, %v727_v47  ;;  %v894_v12 = vld [vmem:[%s3119_s11 + $0x48] sm:$0xff]  ;;  %v896_v15 = vld [vmem:[%s3119_s11 + $0x58] sm:$0xff] }
 0x1d8   :  { %v473_v20 = vrot.slane %v471_v14, 4  ;;  %2197 = vmatprep.mubr.bf16.mxu1 %v1912_v16  ;;  %v479_v26 = vrot.slane %v477_v21, 5  ;;  %v730_v57 = vrot.slane %v2758_v5, 5  ;;  %v733_v63 = vrot.slane %v2760_v6, 5  ;;  %v889_v5 = vld [vmem:[%s3119_s11 + $0x20] sm:$0xff]  ;;  %v890_v6 = vld [vmem:[%s3119_s11 + $0x28] sm:$0xff] }
 0x1d9   :  { %v465_v22 = vrot.slane %v464_v17, 4  ;;  %v1933_v1 = vrot.slane %v713_v60, 9  ;;  %v2388_v8 = vpack.c.bf16 %v890_v6, %v889_v5  ;;  %v2394_v13 = vpack.c.bf16 %v894_v12, %v893_v10  ;;  %v895_v14 = vld [vmem:[%s3119_s11 + $0x50] sm:$0xff]  ;;  %v897_v17 = vld [vmem:[%s3119_s11 + $0x60] sm:$0xff]  ;;  %v898_v18 = vld [vmem:[%s3119_s11 + $0x68] sm:$0xff] }
 0x1da   :  { %v474_v23 = vor.u32 %v473_v20, %v469_v19  ;;  %v732_v59 = vrot.slane %v730_v57, 4  ;;  %v2397_v16 = vpack.c.bf16 %v896_v15, %v895_v14  ;;  %v899_v20 = vld [vmem:[%s3119_s11 + $0x70] sm:$0xff]  ;;  %v900_v21 = vld [vmem:[%s3119_s11 + $0x78] sm:$0xff] }
 0x1db   :  { %v470_v27 = vsel %vm2750_vm15, %v465_v22, %v469_v19  ;;  %v731_v3 = vsel %vm2804_vm4, %v1933_v1, %v730_v57  ;;  %2389 = vmatpush3.bf16.msra.mxu0 %v2388_v8  ;;  %v2400_v19 = vpack.c.bf16 %v898_v18, %v897_v17  ;;  %v2403_v22 = vpack.c.bf16 %v900_v21, %v899_v20  ;;  %v2484_v20 = vld [vmem:[%s3123_s8 + $0x48] sm:$0xff]   ;;  %v2485_v21 = vld [vmem:[%s3123_s8 + $0x50] sm:$0xff]  }
 0x1dc   :  { %v475_v25 = vrot.slane %v474_v23, 4  ;;  %v734_v2 = vsel %vm2804_vm4, %v732_v59, %v733_v63  ;;  %2390 = vmatprep.subr.bf16.mxu0 %v2515_v42  ;;  %v2516_v1 = vmov 1966171168  }
 0x1dd   :  { %v1951_v4 = vcombine.low %v731_v3, %v734_v2  ;;  %v983_v2 = vunpack.c.l.s4 %v2516_v1  ;;  %v985_v3 = vlaneseq }
 0x1de   :  { %v480_v28 = vsel %vm2750_vm15, %v475_v25, %v479_v26 }
 0x1df   :  { %v1913_v30 = vcombine.low %v470_v27, %v480_v28  ;;  %v2925_v5 = vshrl.u32 %v985_v3, 7 }
 0x1e1   :  { %2198 = vmatmul.mubr.bf16.vlgmr.msra.gmra.mrb[12].mxu1 %v1913_v30  ;;  %v2939_v15 = vsub.s32 0, %v2925_v5 }
 0x1e2   :  { %2202 = vmatpush3.bf16.msra.mxu1 %v2684_v41  ;;  %2217 = vmatprep.mubr.bf16.mxu1 %v1922_v31  ;;  %v2472_v41 = vld [vmem:[%s3118_s5 + $0x28] sm:$0xff]  }
 0x1e3   :  { %2203 = vmatprep.subr.bf16.mxu1 %v2468_v11 }
 0x1e6   :  { %2204 = vmatpush3.bf16.msra.mxu1 %v2468_v11 }
 0x1e7   :  { %2205 = vmatprep.subr.bf16.mxu1 %v2469_v29 }
 0x1ea   :  { %2206 = vmatpush3.bf16.msra.mxu1 %v2469_v29 }
 0x1eb   :  { %2207 = vmatprep.subr.bf16.mxu1 %v2470_v33 }
 0x1ee   :  { %2208 = vmatpush3.bf16.msra.mxu1 %v2470_v33 }
 0x1ef   :  { %2209 = vmatprep.subr.bf16.mxu1 %v2471_v32 }
 0x1f2   :  { %2210 = vmatpush3.bf16.msra.mxu1 %v2471_v32 }
 0x1f3   :  { %2211 = vmatprep.subr.bf16.mxu1 %v2472_v41 }
 0x1f6   :  { %2212 = vmatpush3.bf16.msra.mxu1 %v2472_v41 }
 0x1f7   :  { %2213 = vmatprep.subr.bf16.mxu1 %v2473_v34 }
 0x1fa   :  { %2214 = vmatpush3.bf16.msra.mxu1 %v2473_v34 }
 0x1fb   :  { %2215 = vmatprep.subr.bf16.mxu1 %v2474_v36 }
 0x1fe   :  { %2216 = vmatpush3.bf16.msra.mxu1 %v2474_v36 }
 0x1ff   :  { %2221 = vmatprep.subr.bf16.mxu1 %v2475_v43 }
 0x201   :  { %2218 = vmatmul.mubr.bf16.vlgmr.msra.gmra.mrb[12].mxu1 %v1923_v49 }
 0x202   :  { %2222 = vmatpush3.bf16.msra.mxu1 %v2475_v43  ;;  %2237 = vmatprep.mubr.bf16.mxu1 %v1950_v51 }
 0x203   :  { %2223 = vmatprep.subr.bf16.mxu1 %v2476_v39 }
 0x206   :  { %2224 = vmatpush3.bf16.msra.mxu1 %v2476_v39 }
 0x207   :  { %2225 = vmatprep.subr.bf16.mxu1 %v2477_v52 }
 0x20a   :  { %2226 = vmatpush3.bf16.msra.mxu1 %v2477_v52 }
 0x20b   :  { %2227 = vmatprep.subr.bf16.mxu1 %v2478_v53 }
 0x20e   :  { %2228 = vmatpush3.bf16.msra.mxu1 %v2478_v53  ;;  %v2922_v53 = vld [vmem:[%s3120_s12] sm:$0xff] }
 0x20f   :  { %2229 = vmatprep.subr.bf16.mxu1 %v2479_v54 }
 0x212   :  { %2230 = vmatpush3.bf16.msra.mxu1 %v2479_v54 }
 0x213   :  { %2231 = vmatprep.subr.bf16.mxu1 %v2480_v55 }
 0x216   :  { %2232 = vmatpush3.bf16.msra.mxu1 %v2480_v55 }
 0x217   :  { %2233 = vmatprep.subr.bf16.mxu1 %v2481_v56 }
 0x21a   :  { %2234 = vmatpush3.bf16.msra.mxu1 %v2481_v56 }
 0x21b   :  { %2235 = vmatprep.subr.bf16.mxu1 %v2482_v58 }
 0x21e   :  { %2236 = vmatpush3.bf16.msra.mxu1 %v2482_v58 }
 0x21f   :  { %2405 = vmatprep.subr.bf16.mxu1 %v2515_v42 }
 0x221   :  { %2238 = vmatmul.mubr.bf16.vlgmr.msra.gmra.mrb[12].mxu1 %v1951_v4  ;;  %v984_v4 = vunpack.c.0.s8 %v983_v2 }
 0x222   :  { %2407 = vmatpush3.bf16.msra.mxu1 %v2697_v46  ;;  %2373 = vmatprep.mubr.msk.f32.mxu1 %vm2514_vm0, %v2513_v0  ;;  %v891_v46 = vld [vmem:[%s3119_s11 + $0x30] sm:$0xff] }
 0x223   :  { %2408 = vmatprep.subr.bf16.mxu1 %v2515_v42  ;;  %v2928_v6 = vsub.s32 %v984_v4, %v2925_v5 }
 0x226   :  { %2410 = vmatpush3.bf16.msra.mxu1 %v2703_v48  ;;  %v892_v48 = vld [vmem:[%s3119_s11 + $0x38] sm:$0xff] }
 0x227   :  { %2411 = vmatprep.subr.bf16.mxu1 %v2515_v42  ;;  %v2391_v9 = vpack.c.bf16 %v892_v48, %v891_v46 }
 0x229   :  { %2392 = vmatpush3.bf16.msra.mxu0 %v2391_v9 }
 0x22a   :  { %2413 = vmatpush3.bf16.msra.mxu1 %v2388_v8  ;;  %2393 = vmatprep.subr.bf16.mxu0 %v2515_v42 }
 0x22b   :  { %2414 = vmatprep.subr.bf16.mxu1 %v2515_v42 }
 0x22d   :  { %2395 = vmatpush3.bf16.msra.mxu0 %v2394_v13 }
 0x22e   :  { %2416 = vmatpush3.bf16.msra.mxu1 %v2391_v9  ;;  %2396 = vmatprep.subr.bf16.mxu0 %v2515_v42  ;;  %v978_v9 = vld [vmem:[%s3121_s6] sm:$0x1] }
 0x22f   :  { %2417 = vmatprep.subr.bf16.mxu1 %v2515_v42 }
 0x231   :  { %2398 = vmatpush3.bf16.msra.mxu0 %v2397_v16 }
 0x232   :  { %2419 = vmatpush3.bf16.msra.mxu1 %v2394_v13  ;;  %2399 = vmatprep.subr.bf16.mxu0 %v2515_v42  ;;  %v999_v13 = vld [vmem:[%s3122_s7] sm:$0x1] }
 0x233   :  { %2420 = vmatprep.subr.bf16.mxu1 %v2515_v42 }
 0x235   :  { %2401 = vmatpush3.bf16.msra.mxu0 %v2400_v19 }
 0x236   :  { %2422 = vmatpush3.bf16.msra.mxu1 %v2397_v16  ;;  %2402 = vmatprep.subr.bf16.mxu0 %v2515_v42 }
 0x237   :  { %2423 = vmatprep.subr.bf16.mxu1 %v2515_v42 }
 0x239   :  { %2404 = vmatpush3.bf16.msra.mxu0 %v2403_v22 }
 0x23a   :  { %2425 = vmatpush3.bf16.msra.mxu1 %v2400_v19  ;;  %2276 = vmatprep.subr.mxu0 %v2513_v0  ;;  %v2483_v19 = vld [vmem:[%s3123_s8 + $0x40] sm:$0xff]  }
 0x23b   :  { %2426 = vmatprep.subr.bf16.mxu1 %v2515_v42 }
 0x23e   :  { %2428 = vmatpush3.bf16.msra.mxu1 %v2403_v22  ;;  %v2486_v22 = vld [vmem:[%s3123_s8 + $0x58] sm:$0xff]  }
 0x23f   :  { %2376 = vmatprep.subr.mxu1 %v2513_v0 }
 0x2f4   :  { %v2896_v23 = vpop.f32.mrb[12].mxu1 }
 0x2f5   :  { %v2898_v25 = vpop.f32.mrb[13].mxu1  ;;  %v872_v11 = vmul.f32 %v2896_v23, %v2896_v23 }
 0x2f6   :  { %v2900_v26 = vpop.f32.mrb[14].mxu1  ;;  %v870_v28 = vmul.f32 %v2898_v25, %v2898_v25 }
 0x2f7   :  { %v2902_v27 = vpop.f32.mrb[15].mxu1  ;;  %v873_v33 = vmul.f32 %v2900_v26, %v2900_v26 }
 0x2f8   :  { %v861_v42 = vadd.f32 %v2902_v27, %v2898_v25  ;;  %v871_v30 = vmul.f32 %v2902_v27, %v2902_v27 }
 0x2fa   :  { %v862_v31 = vadd.f32 %v2896_v23, %v861_v42  ;;  %v874_v29 = vadd.f32 %v871_v30, %v870_v28  ;;  %v2487_v28 = vld [vmem:[%s3123_s8 + $0x60] sm:$0xff]   ;;  %v2488_v42 = vld [vmem:[%s3123_s8 + $0x68] sm:$0xff]   ;;  %v2489_v30 = vld [vmem:[%s3123_s8 + $0x70] sm:$0xff]  }
 0x2fc   :  { %v863_v32 = vadd.f32 %v2900_v26, %v862_v31  ;;  %v875_v41 = vadd.f32 %v874_v29, %v872_v11  ;;  %v2490_v11 = vld [vmem:[%s3123_s8 + $0x78] sm:$0xff]   ;;  %v2971_v31 = vld [vmem:[%s3123_s8] sm:$0xff]   ;;  %v1093_v29 = vsub.s32 1, %v2925_v5 }
 0x2fe   :  { %v864_v34 = vrot.slane %v863_v32, 4  ;;  %v876_v35 = vadd.f32 %v875_v41, %v873_v33 }
 0x300   :  { %v865_v36 = vadd.f32 %v864_v34, %v863_v32  ;;  %v877_v37 = vrot.slane %v876_v35, 4 }
 0x302   :  { %v866_v40 = vrot.slane %v865_v36, 2  ;;  %v878_v43 = vadd.f32 %v877_v37, %v876_v35 }
 0x304   :  { %v867_v44 = vadd.f32 %v866_v40, %v865_v36  ;;  %v879_v45 = vrot.slane %v878_v43, 2 }
 0x306   :  { %v868_v47 = vrot.slane %v867_v44, 1  ;;  %v880_v49 = vadd.f32 %v879_v45, %v878_v43 }
 0x308   :  { %v881_v50 = vrot.slane %v880_v49, 1  ;;  %v869_v39 = vadd.f32 %v868_v47, %v867_v44 }
 0x30a   :  { %v882_v51 = vadd.f32 %v881_v50, %v880_v49 }
 0x30c   :  { %v884_v52 = vsel %vm321_vm3, %v869_v39, %v882_v51 }
 0x30d   :  { %2274 = vmatmul.mubr.f32.vlgmr.msra.gmra.mrb[4].mxu0 %v884_v52 }
 0x30e   :  { %2278 = vmatprep.mubr.msk.f32.mxu0 %vm2514_vm0, %v2513_v0  ;;  %2277 = vmatpush3.msra.mxu0 %v2922_v53 }
 0x30f   :  { %2281 = vmatprep.subr.bf16.mxu0 %v2483_v19 }
 0x3e0   :  { %v967_v54 = vpop.f32.mrb[4].mxu0 }
 0x3e1   :  { %v971_v55 = vmul.f32 0.001953125, %v967_v54  ;;  %v2275_v56 = vpop.f32.mrb[5].mxu0 }
 0x3e3   :  { %v972_v57 = vmul.f32 %v971_v55, %v971_v55 }
 0x3e5   :  { %v974_v58 = vrot.slane %v972_v57, 7 }
 0x3e7   :  { %v976_v59 = vsub.f32 %v971_v55, %v974_v58 }
 0x3e9   :  { %v977_v60 = vmax.f32 %v976_v59, 0.0 }
 0x3eb   :  { %v979_v63 = vadd.f32 1e-05, %v977_v60 }
 0x3ed   :  { %2509 = vrsqrt.f32 %v979_v63 }
 0x3f7   :  { %v2510_v8 = vpop.eup %2509 }
 0x3f8   :  { %v988_v46 = vrot.slane %v2510_v8, %v2928_v6 }
 0x3fa   :  { %v989_v48 = vcombine.high %v988_v46, %v988_v46 }
 0x3fc   :  { %v996_v10 = vrot.slane %v989_v48, %v2928_v6 }
 0x3fe   :  { %v998_v12 = vmul.f32 %v996_v10, %v978_v9 }
 0x400   :  { %v1000_v14 = vmul.f32 %v998_v12, %v971_v55 }
 0x402   :  { %v1001_v16 = vsub.f32 %v999_v13, %v1000_v14  ;;  %v1167_v14 = vld [vmem:[#allocation2] sm:$0xf] }
 0x404   :  { %v1006_v17 = vrot.slane %v1001_v16, %v2939_v15  ;;  %v1171_v16 = vld [vmem:[#allocation2 + $0x8] sm:$0x1] }
 0x406   :  { %v1008_v18 = vsel %vm321_vm3, %v998_v12, %v1006_v17 }
 0x407   :  { %2279 = vmatmul.mubr.msk.f32.vlgmr.msra.gmra.mrb[6].mxu0 %vm122_vm7, %v1008_v18 }
 0x408   :  { %2282 = vmatpush3.bf16.msra.mxu0 %v2483_v19 }
 0x409   :  { %2283 = vmatprep.subr.bf16.mxu0 %v2484_v20 }
 0x40c   :  { %2284 = vmatpush3.bf16.msra.mxu0 %v2484_v20  ;;  %v1174_v20 = vld [vmem:[#allocation2 + $0xc] sm:$0xf] }
 0x40d   :  { %2285 = vmatprep.subr.bf16.mxu0 %v2485_v21 }
 0x410   :  { %2286 = vmatpush3.bf16.msra.mxu0 %v2485_v21  ;;  %v1178_v21 = vld [vmem:[#allocation2 + $0x14] sm:$0x1] }
 0x411   :  { %2287 = vmatprep.subr.bf16.mxu0 %v2486_v22 }
 0x414   :  { %2288 = vmatpush3.bf16.msra.mxu0 %v2486_v22 }
 0x415   :  { %2289 = vmatprep.subr.bf16.mxu0 %v2487_v28 }
 0x418   :  { %2290 = vmatpush3.bf16.msra.mxu0 %v2487_v28 }
 0x419   :  { %2291 = vmatprep.subr.bf16.mxu0 %v2488_v42 }
 0x41c   :  { %2292 = vmatpush3.bf16.msra.mxu0 %v2488_v42 }
 0x41d   :  { %2293 = vmatprep.subr.bf16.mxu0 %v2489_v30 }
 0x420   :  { %2294 = vmatpush3.bf16.msra.mxu0 %v2489_v30 }
 0x421   :  { %2295 = vmatprep.subr.bf16.mxu0 %v2490_v11 }
 0x424   :  { %2296 = vmatpush3.bf16.msra.mxu0 %v2490_v11 }
 0x425   :  { %2301 = vmatprep.subr.bf16.mxu0 %v2971_v31 }
 0x4da   :  { %v1079_v33 = vpop.f32.mrb[6].mxu0 }
 0x4db   :  { %v1086_v32 = vrot.slane %v1079_v33, %v2939_v15  ;;  %v2280_v41 = vpop.f32.mrb[7].mxu0  ;;  %v1094_v34 = vrot.slane %v1079_v33, %v1093_v29 }
 0x4dd   :  { %v1087_v35 = vmul.f32 %v1086_v32, %v2898_v25  ;;  %v1088_v36 = vmul.f32 %v1086_v32, %v2902_v27  ;;  %v1089_v37 = vmul.f32 %v2896_v23, %v1086_v32  ;;  %v1090_v40 = vmul.f32 %v2900_v26, %v1086_v32 }
 0x4df   :  { %v1095_v43 = vadd.f32 %v1094_v34, %v1087_v35  ;;  %v1096_v44 = vadd.f32 %v1094_v34, %v1088_v36  ;;  %v1097_v45 = vadd.f32 %v1094_v34, %v1089_v37  ;;  %v1098_v47 = vadd.f32 %v1094_v34, %v1090_v40 }
 0x4e1   :  { %v1099_v49 = vmax.f32 %v1095_v43, 0.0  ;;  %v1100_v50 = vmax.f32 %v1096_v44, 0.0  ;;  %v1101_v39 = vmax.f32 %v1097_v45, 0.0  ;;  %v1102_v51 = vmax.f32 %v1098_v47, 0.0 }
 0x4e3   :  { %v2034_v52 = vpack.c.bf16 %v1099_v49, %v1099_v49  ;;  %v2035_v54 = vpack.c.bf16 %v1100_v50, %v1100_v50  ;;  %v2036_v55 = vpack.c.bf16 %v1101_v39, %v1101_v39  ;;  %v2037_v56 = vpack.c.bf16 %v1102_v51, %v1102_v51 }
 0x4e5   :  { %v1128_v57 = vshrl.u32 %v2034_v52, 16  ;;  %v1136_v25 = vshrl.u32 %v2035_v54, 16  ;;  %v1145_v58 = vshrl.u32 %v2036_v55, 16  ;;  %v1153_v27 = vshrl.u32 %v2037_v56, 16 }
 0x4e6   :  { %v1131_v23 = vshll.u32 %v2034_v52, 16  ;;  %v1139_v26 = vshll.u32 %v2035_v54, 16  ;;  %v1148_v1 = vshll.u32 %v2036_v55, 16  ;;  %v1156_v3 = vshll.u32 %v2037_v56, 16 }
 0x4e7   :  { %v1130_v59 = vrot.slane %v1128_v57, 7  ;;  %v1138_v60 = vrot.slane %v1136_v25, 7  ;;  %v1147_v63 = vrot.slane %v1145_v58, 7  ;;  %v1155_v2 = vrot.slane %v1153_v27, 7 }
 0x4e9   :  { %v1133_v4 = vor.u32 %v1131_v23, %v1130_v59  ;;  %v1134_v8 = vrot.slane %v1130_v59, 4  ;;  %v1141_v46 = vor.u32 %v1139_v26, %v1138_v60  ;;  %v1143_v48 = vrot.slane %v1138_v60, 4 }
 0x4ea   :  { %v1150_v9 = vor.u32 %v1148_v1, %v1147_v63  ;;  %v1151_v10 = vrot.slane %v1147_v63, 4  ;;  %v1158_v12 = vor.u32 %v1156_v3, %v1155_v2  ;;  %v1160_v13 = vrot.slane %v1155_v2, 4 }
 0x4eb   :  { %v1142_v17 = vsel %vm2716_vm12, %v1134_v8, %v1141_v46  ;;  %v1168_v18 = vsel %vm2710_vm11, %v1133_v4, %v1167_v14  ;;  %v1172_v19 = vsel %vm2645_vm9, %v1143_v48, %v1171_v16 }
 0x4ec   :  { %v1159_v22 = vsel %vm2716_vm12, %v1151_v10, %v1158_v12  ;;  %1169 = vst [vmem:[#allocation2] sm:$0xf] %v1168_v18  ;;  %1170 = vst [vmem:[#allocation2 + $0x4] sm:$0xf] %v1142_v17  ;;  %v1175_v28 = vsel %vm2710_vm11, %v1150_v9, %v1174_v20  ;;  %v1179_v42 = vsel %vm2645_vm9, %v1160_v13, %v1178_v21  ;;  %v2493_v17 = vld [vmem:[%s3123_s8 + $0x8] sm:$0xff]   ;;  %v2495_v20 = vld [vmem:[%s3123_s8 + $0x18] sm:$0xff]  }
 0x4ed   :  { %1173 = vst [vmem:[#allocation2 + $0x8] sm:$0x1] %v1172_v19  ;;  %1176 = vst [vmem:[#allocation2 + $0xc] sm:$0xf] %v1175_v28  ;;  %v2496_v21 = vld [vmem:[%s3123_s8 + $0x20] sm:$0xff]  }
 0x4ee   :  { %1177 = vst [vmem:[#allocation2 + $0x10] sm:$0xf] %v1159_v22  ;;  %1180 = vst [vmem:[#allocation2 + $0x14] sm:$0x1] %v1179_v42  ;;  %v2498_v22 = vld [vmem:[%s3123_s8 + $0x30] sm:$0xff]   ;;  %v2499_v42 = vld [vmem:[%s3123_s8 + $0x38] sm:$0xff]  }
 0x4f3   :  { %v1181_v30 = vld [vmem:[#allocation2] sm:$0xf]  ;;  %v2994_v11 = vld [vmem:[#allocation2 + $0x4] sm:$0xf] }
 0x4f4   :  { %v2996_v33 = vld [vmem:[#allocation2 + $0x8] sm:$0x1]  ;;  %v1204_v32 = vshrl.u32 %v1181_v30, 16  ;;  %v1207_v7 = vshll.u32 %v1181_v30, 16  ;;  %v1213_v41 = vshll.u32 %v2994_v11, 16  ;;  %v1217_v34 = vshrl.u32 %v2994_v11, 16 }
 0x4f5   :  { %v3000_v35 = vld [vmem:[#allocation2 + $0xc] sm:$0xf]  ;;  %v1223_v61 = vshll.u32 %v2996_v33, 16  ;;  %v3003_v24 = vld [vmem:[#allocation2 + $0x10] sm:$0xf]  ;;  %v1991_v19 = vcombine.low %v1181_v30, %v2994_v11  ;;  %v1490_v28 = vrot.slane %v2994_v11, 5 }
 0x4f6   :  { %v1228_v36 = vshrl.u32 %v3000_v35, 16  ;;  %v1206_v37 = vrot.slane %v1204_v32, 4  ;;  %v1209_v40 = vrot.slane %v1207_v7, 5  ;;  %v1215_v43 = vrot.slane %v1213_v41, 5  ;;  %v1202_v45 = vld [vmem:[#allocation2 + $0x14] sm:$0x1] }
 0x4f7   :  { %v1219_v44 = vrot.slane %v1217_v34, 4  ;;  %v1231_v49 = vshll.u32 %v3000_v35, 16  ;;  %v1237_v50 = vshll.u32 %v3003_v24, 16  ;;  %v1241_v52 = vshrl.u32 %v3003_v24, 16  ;;  %v1483_v54 = vld [vmem:[#allocation2 + $0xc] sm:$0xe] }
 0x4f8   :  { %v1230_v47 = vrot.slane %v1228_v36, 4  ;;  %v1210_v39 = vor.u32 %v1209_v40, %v1206_v37  ;;  %v1225_v55 = vrot.slane %v1223_v61, 5  ;;  %v1247_v59 = vshll.u32 %v1202_v45, 16  ;;  %v1482_v30 = vld [vmem:[#allocation2] sm:$0xe]  ;;  %v2502_v37 = vld [vmem:[%s3123_s8 + $0x88] sm:$0xff]  }
 0x4f9   :  { %v1220_v51 = vor.u32 %v1219_v44, %v1215_v43  ;;  %v1233_v56 = vrot.slane %v1231_v49, 5  ;;  %v1239_v57 = vrot.slane %v1237_v50, 5  ;;  %v1243_v27 = vrot.slane %v1241_v52, 4  ;;  %v2501_v7 = vld [vmem:[%s3123_s8 + $0x80] sm:$0xff]   ;;  %v2508_v44 = vld [vmem:[%s3123_s8 + $0xb8] sm:$0xff]  }
 0x4fa   :  { %v1211_v25 = vrot.slane %v1210_v39, 4  ;;  %v2002_v60 = vrot.slane %v1483_v54, 9  ;;  %v1497_v2 = vrot.slane %v3003_v24, 5  ;;  %v1249_v46 = vrot.slane %v1247_v59, 5 }
 0x4fb   :  { %v1221_v58 = vrot.slane %v1220_v51, 4  ;;  %v1234_v23 = vor.u32 %v1233_v56, %v1230_v47  ;;  %v1244_v1 = vor.u32 %v1243_v27, %v1239_v57  ;;  %v1500_v9 = vrot.slane %v1202_v45, 5 }
 0x4fc   :  { %v1216_v26 = vsel %vm2750_vm15, %v1211_v25, %v1215_v43  ;;  %v1499_v48 = vrot.slane %v1497_v2, 4  ;;  %v3020_v13 = vsel %vm2804_vm4, %v2002_v60, %v1497_v2  ;;  %v1492_v32 = vrot.slane %v1490_v28, 4  ;;  %v2507_v43 = vld [vmem:[%s3123_s8 + $0xb0] sm:$0xff]  }
 0x4fd   :  { %v1226_v63 = vsel %vm2750_vm15, %v1221_v58, %v1225_v55  ;;  %v1235_v4 = vrot.slane %v1234_v23, 4  ;;  %v1245_v8 = vrot.slane %v1244_v1, 4  ;;  %v2001_v41 = vrot.slane %v1482_v30, 9 }
 0x4fe   :  { %v1981_v3 = vcombine.low %v1216_v26, %v1226_v63  ;;  %v3024_v14 = vsel %vm2804_vm4, %v1499_v48, %v1500_v9  ;;  %v1493_v34 = vrot.slane %v2996_v33, 5  ;;  %v1992_v61 = vcombine.low %v3000_v35, %v3003_v24  ;;  %v2503_v33 = vld [vmem:[%s3123_s8 + $0x90] sm:$0xff]   ;;  %v2505_v35 = vld [vmem:[%s3123_s8 + $0xa0] sm:$0xff]   ;;  %v2506_v24 = vld [vmem:[%s3123_s8 + $0xa8] sm:$0xff]  }
 0x4ff   :  { %v1240_v10 = vsel %vm2750_vm15, %v1235_v4, %v1239_v57  ;;  %v1250_v12 = vsel %vm2750_vm15, %v1245_v8, %v1249_v46  ;;  %v2020_v18 = vcombine.low %v3020_v13, %v3024_v14  ;;  %v1491_v36 = vsel %vm2804_vm4, %v2001_v41, %v1490_v28 }
 0x500   :  { %2297 = vmatprep.mubr.bf16.mxu0 %v1981_v3  ;;  %v1982_v16 = vcombine.low %v1240_v10, %v1250_v12  ;;  %v1494_v11 = vsel %vm2804_vm4, %v1492_v32, %v1493_v34 }
 0x501   :  { %v2019_v40 = vcombine.low %v1491_v36, %v1494_v11 }
 0x502   :  { %2298 = vmatmul.mubr.bf16.vlgmr.msra.gmra.mrb[8].mxu0 %v1982_v16 }
 0x503   :  { %2302 = vmatpush3.bf16.msra.mxu0 %v2971_v31  ;;  %2317 = vmatprep.mubr.bf16.mxu0 %v1991_v19  ;;  %v2497_v31 = vld [vmem:[%s3123_s8 + $0x28] sm:$0xff]  }
 0x504   :  { %2303 = vmatprep.subr.bf16.mxu0 %v2493_v17 }
 0x507   :  { %2304 = vmatpush3.bf16.msra.mxu0 %v2493_v17 }
 0x508   :  { %2305 = vmatprep.subr.bf16.mxu0 %v2494_v62 }
 0x50b   :  { %2306 = vmatpush3.bf16.msra.mxu0 %v2494_v62 }
 0x50c   :  { %2307 = vmatprep.subr.bf16.mxu0 %v2495_v20 }
 0x50f   :  { %2308 = vmatpush3.bf16.msra.mxu0 %v2495_v20 }
 0x510   :  { %2309 = vmatprep.subr.bf16.mxu0 %v2496_v21 }
 0x513   :  { %2310 = vmatpush3.bf16.msra.mxu0 %v2496_v21 }
 0x514   :  { %2311 = vmatprep.subr.bf16.mxu0 %v2497_v31 }
 0x517   :  { %2312 = vmatpush3.bf16.msra.mxu0 %v2497_v31 }
 0x518   :  { %2313 = vmatprep.subr.bf16.mxu0 %v2498_v22 }
 0x51b   :  { %2314 = vmatpush3.bf16.msra.mxu0 %v2498_v22  ;;  %v1765_v22 = vld [vmem:[%s3125_s10] sm:$0x1] }
 0x51c   :  { %2315 = vmatprep.subr.bf16.mxu0 %v2499_v42 }
 0x51f   :  { %2316 = vmatpush3.bf16.msra.mxu0 %v2499_v42 }
 0x520   :  { %2321 = vmatprep.subr.bf16.mxu0 %v2501_v7 }
 0x522   :  { %2318 = vmatmul.mubr.bf16.vlgmr.msra.gmra.mrb[8].mxu0 %v1992_v61 }
 0x523   :  { %2322 = vmatpush3.bf16.msra.mxu0 %v2501_v7  ;;  %2337 = vmatprep.mubr.bf16.mxu0 %v2019_v40 }
 0x524   :  { %2323 = vmatprep.subr.bf16.mxu0 %v2502_v37 }
 0x527   :  { %2324 = vmatpush3.bf16.msra.mxu0 %v2502_v37 }
 0x528   :  { %2325 = vmatprep.subr.bf16.mxu0 %v2503_v33 }
 0x52b   :  { %2326 = vmatpush3.bf16.msra.mxu0 %v2503_v33 }
 0x52c   :  { %2327 = vmatprep.subr.bf16.mxu0 %v2504_v38 }
 0x52f   :  { %2328 = vmatpush3.bf16.msra.mxu0 %v2504_v38 }
 0x530   :  { %2329 = vmatprep.subr.bf16.mxu0 %v2505_v35 }
 0x533   :  { %2330 = vmatpush3.bf16.msra.mxu0 %v2505_v35 }
 0x534   :  { %2331 = vmatprep.subr.bf16.mxu0 %v2506_v24 }
 0x537   :  { %2332 = vmatpush3.bf16.msra.mxu0 %v2506_v24 }
 0x538   :  { %2333 = vmatprep.subr.bf16.mxu0 %v2507_v43 }
 0x53b   :  { %2334 = vmatpush3.bf16.msra.mxu0 %v2507_v43 }
 0x53c   :  { %2335 = vmatprep.subr.bf16.mxu0 %v2508_v44 }
 0x53f   :  { %2336 = vmatpush3.bf16.msra.mxu0 %v2508_v44 }
 0x542   :  { %2338 = vmatmul.mubr.bf16.vlgmr.msra.gmra.mrb[8].mxu0 %v2020_v18 }
 0x615   :  { %v2339_v45 = vpop.f32.mrb[8].mxu0 }
 0x616   :  { %v1609_v47 = vpop.f32.mrb[9].mxu0  ;;  %v1639_v54 = vmul.f32 %v2339_v45, %v2339_v45 }
 0x617   :  { %v2340_v49 = vpop.f32.mrb[10].mxu0  ;;  %v1637_v39 = vmul.f32 %v1609_v47, %v1609_v47 }
 0x618   :  { %v1612_v50 = vpop.f32.mrb[11].mxu0  ;;  %v1640_v57 = vmul.f32 %v2340_v49, %v2340_v49 }
 0x619   :  { %v1628_v51 = vadd.f32 %v1612_v50, %v1609_v47  ;;  %v1638_v52 = vmul.f32 %v1612_v50, %v1612_v50 }
 0x61b   :  { %v1629_v55 = vadd.f32 %v2339_v45, %v1628_v51  ;;  %v1641_v56 = vadd.f32 %v1638_v52, %v1637_v39 }
 0x61d   :  { %v1630_v25 = vadd.f32 %v2340_v49, %v1629_v55  ;;  %v1642_v58 = vadd.f32 %v1641_v56, %v1639_v54 }
 0x61f   :  { %v1631_v27 = vrot.slane %v1630_v25, 4  ;;  %v1643_v59 = vadd.f32 %v1642_v58, %v1640_v57 }
 0x621   :  { %v1632_v23 = vadd.f32 %v1631_v27, %v1630_v25  ;;  %v1644_v60 = vrot.slane %v1643_v59, 4 }
 0x623   :  { %v1633_v26 = vrot.slane %v1632_v23, 2  ;;  %v1645_v63 = vadd.f32 %v1644_v60, %v1643_v59 }
 0x625   :  { %v1634_v1 = vadd.f32 %v1633_v26, %v1632_v23  ;;  %v1646_v2 = vrot.slane %v1645_v63, 2 }
 0x627   :  { %v1635_v3 = vrot.slane %v1634_v1, 1  ;;  %v1647_v4 = vadd.f32 %v1646_v2, %v1645_v63 }
 0x629   :  { %v1648_v8 = vrot.slane %v1647_v4, 1  ;;  %v1636_v46 = vadd.f32 %v1635_v3, %v1634_v1 }
 0x62b   :  { %v1649_v48 = vadd.f32 %v1648_v8, %v1647_v4 }
 0x62d   :  { %v1650_v9 = vsel %vm321_vm3, %v1636_v46, %v1649_v48 }
 0x62e   :  { %2374 = vmatmul.mubr.f32.vlgmr.msra.gmra.mrb[16].mxu1 %v1650_v9 }
 0x62f   :  { %2377 = vmatpush3.msra.mxu1 %v2922_v53  ;;  %2378 = vmatprep.mubr.msk.f32.mxu1 %vm2514_vm0, %v2513_v0  ;;  %v1744_v53 = vld [vmem:[%s3124_s9] sm:$0x1] }
 0x701   :  { %v1733_v10 = vpop.f32.mrb[16].mxu1 }
 0x702   :  { %v1737_v12 = vmul.f32 0.001953125, %v1733_v10  ;;  %v2375_v13 = vpop.f32.mrb[17].mxu1 }
 0x704   :  { %v1738_v14 = vmul.f32 %v1737_v12, %v1737_v12 }
 0x706   :  { %v1740_v16 = vrot.slane %v1738_v14, 7 }
 0x708   :  { %v1742_v17 = vsub.f32 %v1737_v12, %v1740_v16 }
 0x70a   :  { %v1743_v18 = vmax.f32 %v1742_v17, 0.0 }
 0x70c   :  { %v1745_v19 = vadd.f32 1e-05, %v1743_v18 }
 0x70e   :  { %2511 = vrsqrt.f32 %v1745_v19 }
 0x718   :  { %v2512_v62 = vpop.eup %2511 }
 0x719   :  { %v1754_v20 = vrot.slane %v2512_v62, %v2928_v6 }
 0x71b   :  { %v1755_v21 = vcombine.high %v1754_v20, %v1754_v20 }
 0x71d   :  { %v1762_v31 = vrot.slane %v1755_v21, %v2928_v6 }
 0x71f   :  { %v1764_v0 = vmul.f32 %v1762_v31, %v1744_v53 }
 0x721   :  { %v1766_v28 = vmul.f32 %v1764_v0, %v1737_v12 }
 0x723   :  { %v1767_v42 = vsub.f32 %v1765_v22, %v1766_v28 }
 0x725   :  { %v1772_v30 = vrot.slane %v1767_v42, %v2939_v15 }
 0x727   :  { %v1774_v32 = vsel %vm321_vm3, %v1764_v0, %v1772_v30 }
 0x728   :  { %2379 = vmatmul.mubr.msk.f32.vlgmr.msra.gmra.mrb[18].mxu1 %vm122_vm7, %v1774_v32 }
 0x7fb   :  { %v1845_v7 = vpop.f32.mrb[18].mxu1 }
 0x7fc   :  { %v1852_v41 = vrot.slane %v1845_v7, %v2939_v15  ;;  %v2380_v34 = vpop.f32.mrb[19].mxu1  ;;  %v1860_v6 = vrot.slane %v1845_v7, %v1093_v29 }
 0x7fe   :  { %v1853_v11 = vmul.f32 %v1852_v41, %v1609_v47  ;;  %v1854_v61 = vmul.f32 %v1852_v41, %v1612_v50  ;;  %v1855_v36 = vmul.f32 %v2339_v45, %v1852_v41  ;;  %v1856_v37 = vmul.f32 %v2340_v49, %v1852_v41 }
 0x800   :  { %v1861_v40 = vadd.f32 %v1860_v6, %v1853_v11  ;;  %v1862_v33 = vadd.f32 %v1860_v6, %v1854_v61  ;;  %v1863_v38 = vadd.f32 %v1860_v6, %v1855_v36  ;;  %v1864_v35 = vadd.f32 %v1860_v6, %v1856_v37 }
 0x802   :  { %v1865_v24 = vmax.f32 %v1861_v40, 0.0  ;;  %v1866_v43 = vmax.f32 %v1862_v33, 0.0  ;;  %v1867_v44 = vmax.f32 %v1863_v38, 0.0  ;;  %v1868_v39 = vmax.f32 %v1864_v35, 0.0 }
 0x804   :  { %1869 = vst [vmem:[%s3126_s13] sm:$0xff] %v1865_v24  ;;  %1870 = vst [vmem:[%s3126_s13 + $0x8] sm:$0xff] %v1866_v43 }
 0x805   :  { %1871 = vst [vmem:[%s3126_s13 + $0x10] sm:$0xff] %v1867_v44  ;;  %1872 = vst [vmem:[%s3126_s13 + $0x18] sm:$0xff] %v1868_v39 }

</bundles_post_ra>
